<compile_context>
chip_gen: v6e
topology: v6e:2x2x1
jax: 0.10.0
libtpu: 0.0.40
codegen_flags: <defaults>
</compile_context>

<pallas_src>
import functools
import numpy as np

import jax
import jax.numpy as jnp
from jax import lax
from jax.experimental import pallas as pl
from jax.experimental.pallas import tpu as pltpu

CHANNELS = 32
DIM_COORD = 3
DIM_FEAT = 1
BN_EPS = 1e-4          # norm_fn = BatchNorm1d(eps=0.0001)

HEAD_OUT_SEM = 2
HEAD_OUT_OFF = 3
HEAD_OUT_PAD = 8       # sem(2) | off(3) | zero pad(3): 8 sublanes in the transposed output
ROW_TILE = 16384       # max rows per grid step
N_SPLIT = 2            # leading "parallel" grid axis for the reduction passes (v7x: 2 TCs)
VMEM_LIMIT = 32 * 1024 * 1024


def _cdiv(a, b):
    return -(-a // b)


def _round_up(n, m):
    return ((n + m - 1) // m) * m


# ----------------------------------------------------------------------------
# Voxelization glue (numpy) -- mirrors voxelize() semantics for the small case
# where no voxel exceeds max_num_points_per_voxel (the module asserts v2p!=-1).
# Also returns per-voxel point counts (needed for the fused head BN statistics).
# ----------------------------------------------------------------------------
def voxelize_np(coords, input_feats, batch_ids, batch_size, voxel_size,
                use_coords=False, use_feats=True):
    pts = np.concatenate([coords, input_feats], axis=1)          # torch.hstack([coords, feats])
    n_points = pts.shape[0]
    voxel_feats_list, counts_list = [], []
    v2p_map = np.zeros((n_points,), dtype=np.int32)
    total_voxels = 0
    for b in range(batch_size):
        idx = np.where(batch_ids == b)[0]
        p = pts[idx]
        mn = p[:, :3].min(axis=0)
        vox = np.floor((p[:, :3] - mn) / voxel_size).astype(np.int64)
        keys = (vox[:, 0] * 1_000_000) + (vox[:, 1] * 1_000) + vox[:, 2]
        uniq, inv = np.unique(keys, return_inverse=True)
        nv = len(uniq)
        sums = np.zeros((nv, p.shape[1]), dtype=np.float64)
        cnts = np.zeros((nv, 1), dtype=np.float64)
        np.add.at(sums, inv, p)
        np.add.at(cnts, inv, 1.0)
        vf = (sums / cnts).astype(np.float32)                     # nanmean over points in voxel
        if not use_coords:
            vf[:, :3] = 1.0
        if not use_feats:
            vf[:, 3:] = 1.0
        vf = np.concatenate([vf[:, 3:], vf[:, :3]], axis=1)       # hstack([feat, coord])
        voxel_feats_list.append(vf)
        counts_list.append(cnts.astype(np.float32))
        v2p_map[idx] = (inv + total_voxels).astype(np.int32)
        total_voxels += nv
    return (np.concatenate(voxel_feats_list, axis=0),
            np.concatenate(counts_list, axis=0),
            v2p_map)


# ----------------------------------------------------------------------------
# Pallas kernels
# ----------------------------------------------------------------------------
def stats_kernel(x_ref, w_ref, sum_ref, sq_ref, *, n_rows, tile, half):
    """Column sum / sum-of-squares of z = x @ w, accumulated over row tiles.

    Grid is (split, half): the leading "parallel" axis splits the row tiles across
    TensorCores; each core owns its own (8, C) accumulator block.  Tail rows and the
    duplicated (clamped) tile on an odd split are masked against the true row count,
    so no input padding copy is needed.
    """
    p = pl.program_id(0)
    i = pl.program_id(1)

    @pl.when(i == 0)
    def _():
        sum_ref[...] = jnp.zeros_like(sum_ref)
        sq_ref[...] = jnp.zeros_like(sq_ref)

    row0 = (p * half + i) * tile                                  # logical (unclamped) offset
    rows = lax.broadcasted_iota(jnp.int32, (tile, 1), 0) + row0
    x = jnp.where(rows < n_rows, x_ref[...], 0.0)                 # zero tail + duplicate tiles
    z = jnp.dot(x, w_ref[...], preferred_element_type=jnp.float32)
    sum_ref[...] += jnp.sum(z, axis=0, keepdims=True)
    sq_ref[...] += jnp.sum(z * z, axis=0, keepdims=True)


def backbone_kernel(x_ref, cnt_ref, w_in_ref, s_ref, t_ref, w1_ref,
                    h_ref, zsum_ref, zsq_ref, *, n_rows, tile, half, num):
    """h = relu(BN(x @ W_in)) per voxel tile + count-weighted head-BN statistics."""
    p = pl.program_id(0)
    i = pl.program_id(1)

    @pl.when(i == 0)
    def _():
        zsum_ref[...] = jnp.zeros_like(zsum_ref)
        zsq_ref[...] = jnp.zeros_like(zsq_ref)

    iota = lax.broadcasted_iota(jnp.int32, (tile, 1), 0)
    blk = jnp.minimum(p * half + i, num - 1)                      # physical tile (== index_map)
    phys_rows = iota + blk * tile
    log_rows = iota + (p * half + i) * tile                       # >= n_rows for duplicate tiles
    x = jnp.where(phys_rows < n_rows, x_ref[...], 0.0)            # keep h finite on tail rows
    wgt = jnp.where(log_rows < n_rows, cnt_ref[...], 0.0)         # 0-weight tail + dup tiles

    z = jnp.dot(x, w_in_ref[...], preferred_element_type=jnp.float32)     # (tile, 32)
    h = jnp.maximum(z * s_ref[...] + t_ref[...], 0.0)                     # BN + ReLU in f32
    h_ref[...] = h

    # Same bf16 MXU path the head pass uses -> statistics consistent with the head matmul.
    zh = jnp.dot(h.astype(jnp.bfloat16), w1_ref[...].astype(jnp.bfloat16),
                 preferred_element_type=jnp.float32)                      # (tile, 64)
    zsum_ref[...] += jnp.sum(wgt * zh, axis=0, keepdims=True)
    zsq_ref[...] += jnp.sum(wgt * (zh * zh), axis=0, keepdims=True)


def head_kernel(x_ref, w1_ref, s_ref, t_ref, w2t_ref, b2t_ref, out_ref):
    """Fused semantic+offset heads, emitted transposed as (8, tile).

    out^T = W2cat^T @ relu(BN(x @ W1cat))^T.  The (8, tile) layout makes the output store
    lane-dense (tile % 128 == 0) instead of an 8/128-lane masked partial store; BN math
    stays in f32 (only MXU inputs are bf16).
    """
    z = jnp.dot(x_ref[...].astype(jnp.bfloat16), w1_ref[...].astype(jnp.bfloat16),
                preferred_element_type=jnp.float32)               # (tile, 64)
    h = jnp.maximum(z * s_ref[...] + t_ref[...], 0.0)
    out_ref[...] = lax.dot_general(
        w2t_ref[...].astype(jnp.bfloat16), h.astype(jnp.bfloat16),
        (((1,), (1,)), ((), ())),                                 # (8,64) . (tile,64)^T
        preferred_element_type=jnp.float32) + b2t_ref[...]


# ----------------------------------------------------------------------------
# Tiled pallas_call wrappers
# ----------------------------------------------------------------------------
def _tiling(n, max_tile, min_tiles, mult):
    """(tile, num_tiles): tile % mult == 0, num = cdiv(n, tile) (no fully-OOB tile)."""
    num = max(min_tiles, _cdiv(n, max_tile))
    tile = _round_up(_cdiv(n, num), mult)
    num = _cdiv(n, tile)
    return tile, num


def _cp(semantics):
    return pltpu.CompilerParams(dimension_semantics=semantics,
                                vmem_limit_bytes=VMEM_LIMIT)


def _column_moments(x, w, max_tile=ROW_TILE):
    """Column sum / sum-of-squares of x @ w (true rows only), split across 2 cores."""
    n, k = x.shape
    c = w.shape[1]
    tile, num = _tiling(n, max_tile, min_tiles=N_SPLIT, mult=8)
    split = min(N_SPLIT, num)
    half = _cdiv(num, split)
    nm1 = num - 1
    kern = functools.partial(stats_kernel, n_rows=n, tile=tile, half=half)
    s, q = pl.pallas_call(
        kern,
        grid=(split, half),
        in_specs=[pl.BlockSpec((tile, k), lambda p, i: (jnp.minimum(p * half + i, nm1), 0)),
                  pl.BlockSpec((k, c), lambda p, i: (0, 0))],
        out_specs=(pl.BlockSpec((8, c), lambda p, i: (p, 0)),
                   pl.BlockSpec((8, c), lambda p, i: (p, 0))),
        out_shape=(jax.ShapeDtypeStruct((8 * split, c), jnp.float32),
                   jax.ShapeDtypeStruct((8 * split, c), jnp.float32)),
        compiler_params=_cp(("parallel", "arbitrary")),
    )(x, w)
    # rows 0, 8, ... hold the per-core partial sums (all 8 rows of a block are identical).
    return (jnp.sum(s[0::8], axis=0, keepdims=True),
            jnp.sum(q[0::8], axis=0, keepdims=True))


def _backbone_and_head_stats(x, cnt, w_in, scale, shift, w1, max_tile=ROW_TILE):
    """Backbone norm over voxels + fused count-weighted head-BN statistics."""
    n, k = x.shape
    c = w_in.shape[1]
    c2 = w1.shape[1]
    tile, num = _tiling(n, max_tile, min_tiles=N_SPLIT, mult=8)
    split = min(N_SPLIT, num)
    half = _cdiv(num, split)
    nm1 = num - 1
    kern = functools.partial(backbone_kernel, n_rows=n, tile=tile, half=half, num=num)
    row_map = lambda p, i: (jnp.minimum(p * half + i, nm1), 0)
    h, zs, zq = pl.pallas_call(
        kern,
        grid=(split, half),
        in_specs=[pl.BlockSpec((tile, k), row_map),
                  pl.BlockSpec((tile, 1), row_map),
                  pl.BlockSpec((k, c), lambda p, i: (0, 0)),
                  pl.BlockSpec((1, c), lambda p, i: (0, 0)),
                  pl.BlockSpec((1, c), lambda p, i: (0, 0)),
                  pl.BlockSpec((c, c2), lambda p, i: (0, 0))],
        out_specs=(pl.BlockSpec((tile, c), row_map),
                   pl.BlockSpec((8, c2), lambda p, i: (p, 0)),
                   pl.BlockSpec((8, c2), lambda p, i: (p, 0))),
        out_shape=(jax.ShapeDtypeStruct((n, c), jnp.float32),
                   jax.ShapeDtypeStruct((8 * split, c2), jnp.float32),
                   jax.ShapeDtypeStruct((8 * split, c2), jnp.float32)),
        compiler_params=_cp(("parallel", "arbitrary")),
    )(x, cnt, w_in, scale, shift, w1)
    return (h,
            jnp.sum(zs[0::8], axis=0, keepdims=True),
            jnp.sum(zq[0::8], axis=0, keepdims=True))


def _head_fused(x, w1, scale, shift, w2t, b2t, max_tile=ROW_TILE):
    """Fused semantic/offset heads; returns (8, Np) with rows sem(2)|off(3)|pad(3)."""
    n, k = x.shape
    c2 = w1.shape[1]
    co = w2t.shape[0]
    tile, num = _tiling(n, max_tile, min_tiles=4, mult=128)   # >=4 tiles: v7x megacore
    return pl.pallas_call(
        head_kernel,
        grid=(num,),
        in_specs=[pl.BlockSpec((tile, k), lambda i: (i, 0)),
                  pl.BlockSpec((k, c2), lambda i: (0, 0)),
                  pl.BlockSpec((1, c2), lambda i: (0, 0)),
                  pl.BlockSpec((1, c2), lambda i: (0, 0)),
                  pl.BlockSpec((co, c2), lambda i: (0, 0)),
                  pl.BlockSpec((co, 1), lambda i: (0, 0))],
        out_specs=pl.BlockSpec((co, tile), lambda i: (0, i)),
        out_shape=jax.ShapeDtypeStruct((co, n), jnp.float32),
        compiler_params=_cp(("parallel",)),
    )(x, w1, scale, shift, w2t, b2t)


def _bn_fold(col_sum, col_sq, n_true, gamma, beta, eps=BN_EPS):
    """Fold train-mode BatchNorm (batch stats, biased var) into scale/shift (tiny XLA)."""
    inv_n = 1.0 / float(n_true)
    mean = col_sum * inv_n
    var = jnp.maximum(col_sq * inv_n - mean * mean, 0.0)
    scale = gamma * lax.rsqrt(var + eps)
    shift = beta - mean * scale
    return scale.astype(jnp.float32), shift.astype(jnp.float32)


# ----------------------------------------------------------------------------
# Parameters (deterministic synthetic init; shapes implied by __init__)
# ----------------------------------------------------------------------------
def init_params(key, channels=CHANNELS, dim_in=DIM_COORD + DIM_FEAT):
    ks = jax.random.split(key, 5)

    def lin(k, fan_in, fan_out):
        return (jax.random.normal(k, (fan_in, fan_out), jnp.float32)
                * (1.0 / np.sqrt(fan_in))).astype(jnp.float32)

    ones = lambda c: jnp.ones((1, c), jnp.float32)
    zeros = lambda c: jnp.zeros((1, c), jnp.float32)
    p = {
        "w_in": lin(ks[0], dim_in, channels),            # SubMConv3d center tap, bias=False
        "out_gamma": ones(channels), "out_beta": zeros(channels),
        # semantic_linear: Linear(32,32) -> BN -> ReLU -> Linear(32,2)
        # (first-layer bias is absorbed exactly by the train-mode BatchNorm that follows,
        #  so it never enters a kernel; kept here only for shape fidelity)
        "sem_w1": lin(ks[1], channels, channels), "sem_b1": zeros(channels),
        "sem_gamma": ones(channels), "sem_beta": zeros(channels),
        "sem_w2": lin(ks[2], channels, HEAD_OUT_SEM), "sem_b2": zeros(HEAD_OUT_SEM),
        # offset_linear: Linear(32,32) -> BN -> ReLU -> Linear(32,3)
        "off_w1": lin(ks[3], channels, channels), "off_b1": zeros(channels),
        "off_gamma": ones(channels), "off_beta": zeros(channels),
        "off_w2": lin(ks[4], channels, HEAD_OUT_OFF), "off_b2": zeros(HEAD_OUT_OFF),
    }
    return p


# ----------------------------------------------------------------------------
# Forward wrapper (== TreeLearn.forward(batch, return_loss=False))
# ----------------------------------------------------------------------------
def treelearn_forward(coords, input_feats, batch_ids, batch_size, params,
                      voxel_size=0.1, use_coords=False, use_feats=True,
                      row_tile=ROW_TILE):
    c = CHANNELS

    # ---- forward_backbone: voxelize (glue) + sparse backbone (Pallas, two-pass BN) ----
    voxel_feats_np, counts_np, v2p_map_np = voxelize_np(
        coords, input_feats, batch_ids, batch_size, voxel_size, use_coords, use_feats)
    voxel_feats = jnp.asarray(voxel_feats_np, jnp.float32)        # (Nv, 4)
    counts = jnp.asarray(counts_np, jnp.float32)                  # (Nv, 1) points per voxel
    nv = voxel_feats.shape[0]

    # Fused head parameters: W1 column-concat, W2^T row-stacked (8, 64) + bias column.
    w1_cat = jnp.concatenate([params["sem_w1"], params["off_w1"]], axis=1)      # (32, 64)
    gamma_cat = jnp.concatenate([params["sem_gamma"], params["off_gamma"]], axis=1)
    beta_cat = jnp.concatenate([params["sem_beta"], params["off_beta"]], axis=1)
    w2t = jnp.zeros((HEAD_OUT_PAD, 2 * c), jnp.float32)
    w2t = w2t.at[0:HEAD_OUT_SEM, :c].set(params["sem_w2"].T)
    w2t = w2t.at[HEAD_OUT_SEM:HEAD_OUT_SEM + HEAD_OUT_OFF, c:].set(params["off_w2"].T)
    b2t = jnp.zeros((HEAD_OUT_PAD, 1), jnp.float32)
    b2t = b2t.at[0:HEAD_OUT_SEM, 0].set(params["sem_b2"][0])
    b2t = b2t.at[HEAD_OUT_SEM:HEAD_OUT_SEM + HEAD_OUT_OFF, 0].set(params["off_b2"][0])

    # pass 1: backbone BN statistics over voxels (no padding copy; tail masked in-kernel)
    s_v, q_v = _column_moments(voxel_feats, params["w_in"], max_tile=row_tile)
    scale_v, shift_v = _bn_fold(s_v, q_v, nv, params["out_gamma"], params["out_beta"])

    # pass 2: backbone norm + count-weighted head BN statistics (voxel level)
    voxel_backbone, zs, zq = _backbone_and_head_stats(
        voxel_feats, counts, params["w_in"], scale_v, shift_v, w1_cat, max_tile=row_tile)

    # ---- forward_head: gather (glue) + fused semantic/offset MLPs (Pallas) ----
    v2p_map = jnp.asarray(v2p_map_np, jnp.int32)
    backbone_feats = jnp.take(voxel_backbone, v2p_map, axis=0)    # features[v2p_map]  (Np, 32)
    n_pts = backbone_feats.shape[0]

    scale_p, shift_p = _bn_fold(zs, zq, n_pts, gamma_cat, beta_cat)

    # pass 3: fused heads, output transposed (8, Np) for lane-dense stores
    head_t = _head_fused(backbone_feats, w1_cat, scale_p, shift_p, w2t, b2t,
                         max_tile=row_tile)

    return {
        "backbone_feats": backbone_feats,
        "semantic_prediction_logits": head_t[0:HEAD_OUT_SEM, :].T,
        "offset_predictions": head_t[HEAD_OUT_SEM:HEAD_OUT_SEM + HEAD_OUT_OFF, :].T,
    }


# ----------------------------------------------------------------------------
if __name__ == "__main__":
    key = jax.random.PRNGKey(0)
    kc, kf, kp = jax.random.split(key, 3)

    batch_size = 2
    n_per_batch = 1000
    n_points = batch_size * n_per_batch

    coords = np.asarray(jax.random.uniform(kc, (n_points, 3), jnp.float32)) * 1.5
    input_feats = np.asarray(jax.random.uniform(kf, (n_points, 1), jnp.float32))
    batch_ids = np.repeat(np.arange(batch_size), n_per_batch).astype(np.int32)

    params = init_params(kp)

    out = treelearn_forward(coords, input_feats, batch_ids, batch_size, params,
                            voxel_size=0.1, use_coords=False, use_feats=True)
    out = jax.tree_util.tree_map(jax.block_until_ready, out)

    assert out["backbone_feats"].shape == (n_points, CHANNELS)
    assert out["semantic_prediction_logits"].shape == (n_points, HEAD_OUT_SEM)
    assert out["offset_predictions"].shape == (n_points, HEAD_OUT_OFF)
    assert all(bool(jnp.all(jnp.isfinite(v))) for v in out.values())
    print("KERNEL_OK")
</pallas_src>

<mosaic_0001>
module attributes {stable_mosaic.version = 11 : i64} {
  func.func @stats_kernel(%arg0: i32, %arg1: i32, %arg2: memref<880x4xf32, #tpu.memory_space<vmem>>, %arg3: memref<4x32xf32, #tpu.memory_space<vmem>>, %arg4: memref<8x32xf32, #tpu.memory_space<vmem>>, %arg5: memref<8x32xf32, #tpu.memory_space<vmem>>) attributes {dimension_semantics = [#tpu.dimension_semantics<parallel>, #tpu.dimension_semantics<arbitrary>], iteration_bounds = array<i64: 2, 1>, scalar_prefetch = 0 : i64, scratch_operands = 0 : i64, tpu.core_type = #tpu.core_type<tc>, window_params = [{transform_indices = @transform_0, window_bounds = array<i64: 880, 4>}, {pipeline_mode = #tpu.pipeline_mode<synchronous>, transform_indices = @transform_1, window_bounds = array<i64: 4, 32>}, {transform_indices = @transform_2, window_bounds = array<i64: 8, 32>}, {transform_indices = @transform_3, window_bounds = array<i64: 8, 32>}]} {
    %c0_i32 = arith.constant 0 : i32
    %0 = arith.cmpi eq, %arg1, %c0_i32 : i32
    %1 = arith.extui %0 : i1 to i32
    %c0_i32_0 = arith.constant 0 : i32
    %2 = arith.cmpi ne, %1, %c0_i32_0 : i32
    scf.if %2 {
      %cst_15 = arith.constant 0.000000e+00 : f32
      %31 = vector.broadcast %cst_15 : f32 to vector<8x32xf32>
      %c0_16 = arith.constant 0 : index
      %c0_17 = arith.constant 0 : index
      %32 = vector.load %arg4[%c0_16, %c0_17] : memref<8x32xf32, #tpu.memory_space<vmem>>, vector<8x32xf32>
      tpu.vector_store %arg4[%c0_16, %c0_17], %31 {strides = array<i32>} : memref<8x32xf32, #tpu.memory_space<vmem>>, vector<8x32xf32>,
      %cst_18 = arith.constant 0.000000e+00 : f32
      %33 = vector.broadcast %cst_18 : f32 to vector<8x32xf32>
      %c0_19 = arith.constant 0 : index
      %c0_20 = arith.constant 0 : index
      %34 = vector.load %arg5[%c0_19, %c0_20] : memref<8x32xf32, #tpu.memory_space<vmem>>, vector<8x32xf32>
      tpu.vector_store %arg5[%c0_19, %c0_20], %33 {strides = array<i32>} : memref<8x32xf32, #tpu.memory_space<vmem>>, vector<8x32xf32>,
    } else {
    }
    %c1_i32 = arith.constant 1 : i32
    %3 = arith.muli %arg0, %c1_i32 : i32
    %4 = arith.addi %3, %arg1 : i32
    %c880_i32 = arith.constant 880 : i32
    %5 = arith.muli %4, %c880_i32 : i32
    %6 = tpu.iota {dimensions = array<i32: 0>} : vector<880x1xi32>
    %7 = vector.broadcast %5 : i32 to vector<880x1xi32>
    %8 = arith.addi %6, %7 : vector<880x1xi32>
    %c1749_i32 = arith.constant 1749 : i32
    %9 = vector.broadcast %c1749_i32 : i32 to vector<880x1xi32>
    %10 = arith.cmpi slt, %8, %9 : vector<880x1xi32>
    %c0 = arith.constant 0 : index
    %c0_1 = arith.constant 0 : index
    %11 = vector.load %arg2[%c0, %c0_1] : memref<880x4xf32, #tpu.memory_space<vmem>>, vector<880x4xf32>
    %cst = arith.constant 0.000000e+00 : f32
    %12 = vector.shape_cast %10 : vector<880x1xi1> to vector<880x1xi1>
    %13 = vector.broadcast %12 : vector<880x1xi1> to vector<880x4xi1>
    %14 = vector.broadcast %cst : f32 to vector<880x4xf32>
    %15 = arith.select %13, %11, %14 : vector<880x4xi1>, vector<880x4xf32>
    %c0_2 = arith.constant 0 : index
    %c0_3 = arith.constant 0 : index
    %16 = vector.load %arg3[%c0_2, %c0_3] : memref<4x32xf32, #tpu.memory_space<vmem>>, vector<4x32xf32>
    %cst_4 = arith.constant dense<0.000000e+00> : vector<880x32xf32>
    %17 = tpu.matmul %15, %16, %cst_4 {dimension_numbers = #tpu.dot_dimension_numbers<[1], [0], [0], [1], [0, 0, 1, 1], [], []>} : vector<880x4xf32>, vector<4x32xf32>, vector<880x32xf32> -> vector<880x32xf32>
    %c0_5 = arith.constant 0 : index
    %c0_6 = arith.constant 0 : index
    %18 = vector.load %arg4[%c0_5, %c0_6] : memref<8x32xf32, #tpu.memory_space<vmem>>, vector<8x32xf32>
    %cst_7 = arith.constant dense<0.000000e+00> : vector<32xf32>
    %19 = vector.multi_reduction <add>, %17, %cst_7 [0] : vector<880x32xf32> to vector<32xf32>
    %20 = vector.shape_cast %19 : vector<32xf32> to vector<1x32xf32>
    %21 = vector.broadcast %20 : vector<1x32xf32> to vector<8x32xf32>
    %22 = arith.addf %18, %21 : vector<8x32xf32>
    %c0_8 = arith.constant 0 : index
    %c0_9 = arith.constant 0 : index
    %23 = vector.load %arg4[%c0_8, %c0_9] : memref<8x32xf32, #tpu.memory_space<vmem>>, vector<8x32xf32>
    tpu.vector_store %arg4[%c0_8, %c0_9], %22 {strides = array<i32>} : memref<8x32xf32, #tpu.memory_space<vmem>>, vector<8x32xf32>,
    %c0_10 = arith.constant 0 : index
    %c0_11 = arith.constant 0 : index
    %24 = vector.load %arg5[%c0_10, %c0_11] : memref<8x32xf32, #tpu.memory_space<vmem>>, vector<8x32xf32>
    %25 = arith.mulf %17, %17 : vector<880x32xf32>
    %cst_12 = arith.constant dense<0.000000e+00> : vector<32xf32>
    %26 = vector.multi_reduction <add>, %25, %cst_12 [0] : vector<880x32xf32> to vector<32xf32>
    %27 = vector.shape_cast %26 : vector<32xf32> to vector<1x32xf32>
    %28 = vector.broadcast %27 : vector<1x32xf32> to vector<8x32xf32>
    %29 = arith.addf %24, %28 : vector<8x32xf32>
    %c0_13 = arith.constant 0 : index
    %c0_14 = arith.constant 0 : index
    %30 = vector.load %arg5[%c0_13, %c0_14] : memref<8x32xf32, #tpu.memory_space<vmem>>, vector<8x32xf32>
    tpu.vector_store %arg5[%c0_13, %c0_14], %29 {strides = array<i32>} : memref<8x32xf32, #tpu.memory_space<vmem>>, vector<8x32xf32>,
    return
  }
  func.func @transform_0(%arg0: i32, %arg1: i32) -> (i32, i32) {
    %c1_i32 = arith.constant 1 : i32
    %0 = arith.muli %arg0, %c1_i32 : i32
    %1 = arith.addi %0, %arg1 : i32
    %c1_i32_0 = arith.constant 1 : i32
    %2 = arith.minsi %1, %c1_i32_0 : i32
    %c0_i32 = arith.constant 0 : i32
    %c0_i32_1 = arith.constant 0 : i32
    return %2, %c0_i32 : i32, i32
  }
  func.func @transform_1(%arg0: i32, %arg1: i32) -> (i32, i32) {
    %c0_i32 = arith.constant 0 : i32
    %c0_i32_0 = arith.constant 0 : i32
    %c0_i32_1 = arith.constant 0 : i32
    return %c0_i32, %c0_i32_0 : i32, i32
  }
  func.func @transform_2(%arg0: i32, %arg1: i32) -> (i32, i32) {
    %c0_i32 = arith.constant 0 : i32
    %c0_i32_0 = arith.constant 0 : i32
    return %arg0, %c0_i32 : i32, i32
  }
  func.func @transform_3(%arg0: i32, %arg1: i32) -> (i32, i32) {
    %c0_i32 = arith.constant 0 : i32
    %c0_i32_0 = arith.constant 0 : i32
    return %arg0, %c0_i32 : i32, i32
  }
}

</mosaic_0001>

<bundles_post_ra>
// kernel: tpu_custom_call.1
= control target key start
LH: loop header
LB: loop body
LE: loop exit
PB: predicated region body
PF: predicated region fallthrough
CT: control target
= control target key end

     0   :  { %9 = vsyncpa [#allocation3], 0  ;;  %s4381_s0 = inlined_call_operand.vmem [shape: f32[1749,4], index: 0, kind: input, shape index: {}]   ;;  %s4382_s1 = inlined_call_operand.vmem [shape: f32[4,32], index: 1, kind: input, shape index: {}]   ;;  %s4383_s2 = inlined_call_operand.hbm [shape: f32[16,32], index: 2, kind: output, shape index: {0}]   ;;  %s4384_s3 = inlined_call_operand.hbm [shape: f32[16,32], index: 3, kind: output, shape index: {1}]  }
   0x1   :  { %11 = vsyncpa [#allocation3 + $0x1], 0 }
   0x2   :  { %12 = vsyncpa [#allocation5], 0 }
   0x3   :  { %14 = vsyncpa [#allocation5 + $0x1], 0  ;;  %s3262_s12 = smov 0   ;;  %s3264_s13 = smov 0  }
   0x4   :  { %s3266_s14 = smov 0   ;;  %s3268_s15 = smov 0  }
   0x5   :  { %s3270_s16 = smov 0   ;;  %s3272_s17 = smov 0  }
   0x6 LB: > { %s2665_s18 = sadd.s32 4294967295, %s3237_s17   ;;  %s2666_s19 = sadd.s32 4294967294, %s3237_s17   ;;  %s3237_s17 = sphi %s3272_s17, %s20_s17   ;;  %s3233_s16 = sphi %s3270_s16, %s4391_s16   ;;  %s3229_s15 = sphi %s3268_s15, %s4390_s15   ;;  %s3225_s14 = sphi %s3266_s14, %s4389_s14   ;;  %s3221_s13 = sphi %s3264_s13, %s4388_s13   ;;  %s3217_s12 = sphi %s3262_s12, %s4387_s12  }
   0x7   : > { %s32_s20 = sadd.s32 1, %s3233_s16  ;;  %s92_s21 = sadd.s32 1, %s3225_s14 }
   0x8   : > { %p34_p0 = scmp.ge.s32.totalorder %s32_s20, 2  ;;  %p102_p1 = scmp.ne.s32.totalorder %s3225_s14, %s3221_s13 }
   0x9   : > { %p103_p2 = scmp.eq.s32.totalorder %s2665_s18, 1  ;;  %p108_p3 = scmp.ne.s32.totalorder %s3221_s13, %s3217_s12 }
   0xa   : > { %s4393_s20 = smov (%p34_p0, %s32_s20), 0  ;;  %p109_p5 = scmp.eq.s32.totalorder %s2666_s19, 1 }
   0xb   : > { %p3302_p4 = por %p103_p2, %p102_p1  ;;  %s89_s23 = ssub.s32 %s3233_s16, %s4393_s20 }
   0xc   : > { %p2669_p6 = scmp.ge.s32.totalorder %s3237_s17, 1  ;;  %p90_p7 = scmp.eq.s32.totalorder %s89_s23, 0 }
   0xd   : > { %p3309_p8 = por %p109_p5, %p108_p3  ;;  %p179_p9 = scmp.lt.s32.totalorder %s3237_s17, 3 }
   0xe   : > { %s3315_s25 = scalar_select %p90_p7, %s3225_s14, %s92_s21  }
   0xf   : > { %p180_p10 = pnand %p2669_p6, %p179_p9 }
  0x10   : > { %p216_p11 = scmp.lt.s32.totalorder (!%p180_p10), %s3229_s15, 1  ;;  %s243_s28 = smul.u32 (!%p180_p10), 880, %s3229_s15 }
  0x11   : > { %183 = sbr.rel (%p180_p10) target bundleno = 499 (0x1f3), region = 28  ;;  %s3993_s8 = sand.u32 (!%p180_p10), 1, %s3221_s13  }
  0x12   : > { %s2670_s9 = sshll.u32 (!%p180_p10), %s3993_s8, 3  ;;  %s2786_s18 = sshll.u32 (!%p180_p10), %s3229_s15, 7 }
  0x13   : > { %s4012_s10 = scalar_lea.vmem (!%p180_p10), [#allocation2], %s2670_s9  ;;  %s4016_s11 = scalar_lea.vmem (!%p180_p10), [#allocation4], %s2670_s9 }
  0x14   : > { %s2553_s19 = sshll.u32 (!%p180_p10), %s4012_s10, 4  ;;  %s2566_s21 = sshll.u32 (!%p180_p10), %s4016_s11, 4  ;;  %s4304_s19 = int_to_ptr.vmem [resolvable:$true] %s2553_s19  ;;  %s4313_s21 = int_to_ptr.vmem [resolvable:$true] %s2566_s21 }
  0x15   : > { %s4302_s27 = scalar_lea.hbm (!%p180_p10), %s4383_s2, %s2786_s18  ;;  %s3240_s5 = smov (!%p180_p10), [#allocation2]  }
  0x16   : > { %v1016_v0 = vld [vmem:[%s4382_s1] sm:$0xf]  ;;  %vm1348_vm0 = vcmask 1043456   ;;  %v244_v1 = vlaneseq  ;;  %s217_s29 = scalar_select %p216_p11, %s3229_s15, 1  ;;  %v3325_v3 = vstv %s243_s28  ;;  %vm1017_vm4 = vcmask 31744  }
  0x17   : > { %2901 = vmatprep.subr.msk.mxu0 %vm1348_vm0, %v1016_v0  ;;  %3068 = vmatprep.subr.msk.mxu1 %vm1348_vm0, %v1016_v0  ;;  %s3135_s6 = sshll.u32 %s3240_s5, 4  ;;  %s3136_s6 = int_to_ptr.vmem [resolvable:$false] %s3135_s6 }
  0x18   : > { %2902 = vmatpush3.msk.msra.mxu0 %vm1348_vm0, %v1016_v0  ;;  %v3323_v2 = vshrl.u32 %v244_v1, 7  ;;  %3069 = vmatpush3.msk.msra.mxu1 %vm1348_vm0, %v1016_v0  ;;  %s218_s30 = smul.u32 110, %s217_s29  ;;  %s4311_s29 = scalar_lea.hbm %s4384_s3, %s2786_s18 }
  0x19   : > { %p3138_p2 = scmp.lt.s32.totalorder %s4304_s19, %s3136_s6 }
  0x1a   : > { %v246_v4 = vadd.s32 8, %v3323_v2  ;;  %v247_v5 = vadd.s32 16, %v3323_v2  ;;  %v248_v6 = vadd.s32 24, %v3323_v2  ;;  %p223_p12 = scmp.lt.s32.totalorder %s218_s30, 218  ;;  %v356_v7 = vadd.s32 %v3325_v3, %v3323_v2 }
  0x1b   : > { %v249_v10 = vadd.s32 32, %v3323_v2  ;;  %v250_v11 = vadd.s32 40, %v3323_v2  ;;  %v251_v13 = vadd.s32 48, %v3323_v2  ;;  %v252_v19 = vadd.s32 56, %v3323_v2 }
  0x1c   : > { %v357_v8 = vadd.s32 %v3325_v3, %v246_v4  ;;  %v358_v9 = vadd.s32 %v3325_v3, %v247_v5  ;;  %s4395_s30 = smov (!%p223_p12, %s218_s30), 218  ;;  %v359_v12 = vadd.s32 %v3325_v3, %v248_v6  ;;  %vm466_vm1 = vcmp.lt.s32.totalorder %v356_v7, 1749 }
  0x1d   : > { %s2672_s4 = sshll.u32 %s4395_s30, 3  ;;  %v360_v14 = vadd.s32 %v3325_v3, %v249_v10  ;;  %v361_v18 = vadd.s32 %v3325_v3, %v250_v11  ;;  %v362_v25 = vadd.s32 %v3325_v3, %v251_v13  ;;  %v253_v26 = vadd.s32 64, %v3323_v2  ;;  %s2535_s30 = scalar_lea.sflag [#allocation3], %s3993_s8 }
  0x1e   : > { %vm467_vm2 = vcmp.lt.s32.totalorder %v357_v8, 1749  ;;  %vm468_vm3 = vcmp.lt.s32.totalorder %v358_v9, 1749  ;;  %s3342_s7 = scalar_lea.vmem %s4381_s0, %s2672_s4  ;;  %vm469_vm5 = vcmp.lt.s32.totalorder %v359_v12, 1749  ;;  %v363_v30 = vadd.s32 %v3325_v3, %v252_v19  ;;  %s3131_s4 = scalar_lea.vmem %s4304_s19, 128 }
  0x1f   : > { %v576_v15 = vld [vmem:[%s3342_s7] sm:$0xff]  ;;  %v577_v16 = vld [vmem:[%s3342_s7 + $0x8] sm:$0xff]  ;;  %v578_v17 = vld [vmem:[%s3342_s7 + $0x10] sm:$0xff]  ;;  %vm470_vm6 = vcmp.lt.s32.totalorder %v360_v14, 1749  ;;  %vm471_vm7 = vcmp.lt.s32.totalorder %v361_v18, 1749  ;;  %v254_v31 = vadd.s32 72, %v3323_v2  ;;  %v364_v33 = vadd.s32 %v3325_v3, %v253_v26  ;;  %p3132_p13 = scmp.ne.s32.totalorder %s4304_s19, %s3131_s4 }
  0x20   : > { %v906_v20 = vsel %vm466_vm1, %v576_v15, 0.0  ;;  %v907_v21 = vsel %vm467_vm2, %v577_v16, 0.0  ;;  %v908_v22 = vsel %vm468_vm3, %v578_v17, 0.0  ;;  %v579_v23 = vld [vmem:[%s3342_s7 + $0x18] sm:$0xff]  ;;  %v580_v24 = vld [vmem:[%s3342_s7 + $0x20] sm:$0xff]  ;;  %v581_v29 = vld [vmem:[%s3342_s7 + $0x28] sm:$0xff] }
  0x21   : > { %2903 = vmatprep.mubr.msk.f32.mxu0 %vm1017_vm4, %v906_v20  ;;  %v909_v27 = vsel %vm469_vm5, %v579_v23, 0.0  ;;  %v910_v28 = vsel %vm470_vm6, %v580_v24, 0.0  ;;  %vm472_vm8 = vcmp.lt.s32.totalorder %v362_v25, 1749  ;;  %v582_v32 = vld [vmem:[%s3342_s7 + $0x30] sm:$0xff]  ;;  %v255_v34 = vadd.s32 80, %v3323_v2  ;;  %v583_v37 = vld [vmem:[%s3342_s7 + $0x38] sm:$0xff]  ;;  %p3133_p0 = pnand %p3132_p13, %p3302_p4 }
  0x22   : > { %2904 = vmatmul.mubr.msk.f32.vlgmr.msra.gmra.mxu0 %vm1017_vm4, %v907_v21  ;;  %v911_v35 = vsel %vm471_vm7, %v581_v29, 0.0  ;;  %v912_v36 = vsel %vm472_vm8, %v582_v32, 0.0  ;;  %vm473_vm9 = vcmp.lt.s32.totalorder %v363_v30, 1749  ;;  %v365_v38 = vadd.s32 %v3325_v3, %v254_v31  ;;  %v584_v40 = vld [vmem:[%s3342_s7 + $0x40] sm:$0xff]  ;;  %v585_v45 = vld [vmem:[%s3342_s7 + $0x48] sm:$0xff]  ;;  %v586_v48 = vld [vmem:[%s3342_s7 + $0x50] sm:$0xff] }
  0x23   : > { %2906 = vmatprep.mubr.msk.f32.mxu0 %vm1017_vm4, %v908_v22  ;;  %v256_v39 = vadd.s32 88, %v3323_v2  ;;  %vm474_vm10 = vcmp.lt.s32.totalorder %v364_v33, 1749  ;;  %v366_v41 = vadd.s32 %v3325_v3, %v255_v34  ;;  %v257_v42 = vadd.s32 96, %v3323_v2  ;;  %v587_v53 = vld [vmem:[%s3342_s7 + $0x58] sm:$0xff]  ;;  %v588_v56 = vld [vmem:[%s3342_s7 + $0x60] sm:$0xff]  ;;  %v589_v61 = vld [vmem:[%s3342_s7 + $0x68] sm:$0xff]  ;;  %p3134_p1 = pneg %p3133_p0 }
  0x24   : > { %v913_v43 = vsel %vm473_vm9, %v583_v37, 0.0  ;;  %v914_v44 = vsel %vm474_vm10, %v584_v40, 0.0  ;;  %vm475_vm11 = vcmp.lt.s32.totalorder %v365_v38, 1749  ;;  %v258_v47 = vadd.s32 104, %v3323_v2  ;;  %v590_v0 = vld [vmem:[%s3342_s7 + $0x70] sm:$0xff]  ;;  %v591_v7 = vld [vmem:[%s3342_s7 + $0x78] sm:$0xff] }
  0x25   : > { %v367_v46 = vadd.s32 %v3325_v3, %v256_v39  ;;  %vm476_vm12 = vcmp.lt.s32.totalorder %v366_v41, 1749  ;;  %v368_v49 = vadd.s32 %v3325_v3, %v257_v42  ;;  %v259_v50 = vadd.s32 112, %v3323_v2  ;;  %v592_v10 = vld [vmem:[%s3342_s7 + $0x80] sm:$0xff]  ;;  %v593_v15 = vld [vmem:[%s3342_s7 + $0x88] sm:$0xff]  ;;  %v594_v18 = vld [vmem:[%s3342_s7 + $0x90] sm:$0xff] }
  0x26   : > { %2907 = vmatmul.mubr.msk.f32.gmra.mxu0 %vm1017_vm4, %v909_v27  ;;  %v915_v51 = vsel %vm475_vm11, %v585_v45, 0.0  ;;  %v916_v52 = vsel %vm476_vm12, %v586_v48, 0.0  ;;  %v369_v54 = vadd.s32 %v3325_v3, %v258_v47  ;;  %v260_v55 = vadd.s32 120, %v3323_v2  ;;  %v595_v26 = vld [vmem:[%s3342_s7 + $0x98] sm:$0xff]  ;;  %v596_v29 = vld [vmem:[%s3342_s7 + $0xa0] sm:$0xff]  ;;  %v597_v39 = vld [vmem:[%s3342_s7 + $0xa8] sm:$0xff] }
  0x27   : > { %2909 = vmatprep.mubr.msk.f32.mxu0 %vm1017_vm4, %v910_v28  ;;  %vm477_vm13 = vcmp.lt.s32.totalorder %v367_v46, 1749  ;;  %vm478_vm14 = vcmp.lt.s32.totalorder %v368_v49, 1749  ;;  %v370_v57 = vadd.s32 %v3325_v3, %v259_v50  ;;  %v261_v58 = vadd.s32 128, %v3323_v2  ;;  %v598_v42 = vld [vmem:[%s3342_s7 + $0xb0] sm:$0xff]  ;;  %v600_v47 = vld [vmem:[%s3342_s7 + $0xc0] sm:$0xff]  ;;  %v601_v48 = vld [vmem:[%s3342_s7 + $0xc8] sm:$0xff] }
  0x28   : > { %v917_v59 = vsel %vm477_vm13, %v587_v53, 0.0  ;;  %v918_v60 = vsel %vm478_vm14, %v588_v56, 0.0  ;;  %vm479_vm15 = vcmp.lt.s32.totalorder %v369_v54, 1749  ;;  %v371_v62 = vadd.s32 %v3325_v3, %v260_v55  ;;  %v603_v56 = vld [vmem:[%s3342_s7 + $0xd8] sm:$0xff] }
  0x29   : > { %v262_v63 = vadd.s32 136, %v3323_v2  ;;  %vm480_vm0 = vcmp.lt.s32.totalorder %v370_v57, 1749  ;;  %v372_v1 = vadd.s32 %v3325_v3, %v261_v58  ;;  %v263_v4 = vadd.s32 144, %v3323_v2  ;;  %v604_v57 = vld [vmem:[%s3342_s7 + $0xe0] sm:$0xff] }
  0x2a   : > { %2910 = vmatmul.mubr.msk.f32.gmra.mxu0 %vm1017_vm4, %v911_v35  ;;  %v919_v5 = vsel %vm479_vm15, %v589_v61, 0.0  ;;  %v920_v6 = vsel %vm480_vm0, %v590_v0, 0.0  ;;  %vm481_vm1 = vcmp.lt.s32.totalorder %v371_v62, 1749  ;;  %v264_v9 = vadd.s32 152, %v3323_v2  ;;  %v606_v62 = vld [vmem:[%s3342_s7 + $0xf0] sm:$0xff] }
  0x2b   : > { %2912 = vmatprep.mubr.msk.f32.mxu0 %vm1017_vm4, %v912_v36  ;;  %v373_v8 = vadd.s32 %v3325_v3, %v262_v63  ;;  %vm482_vm2 = vcmp.lt.s32.totalorder %v372_v1, 1749  ;;  %v374_v11 = vadd.s32 %v3325_v3, %v263_v4  ;;  %v265_v12 = vadd.s32 160, %v3323_v2 }
  0x2c   : > { %v921_v13 = vsel %vm481_vm1, %v591_v7, 0.0  ;;  %v922_v14 = vsel %vm482_vm2, %v592_v10, 0.0  ;;  %v375_v16 = vadd.s32 %v3325_v3, %v264_v9  ;;  %v266_v17 = vadd.s32 168, %v3323_v2 }
  0x2d   : > { %vm483_vm3 = vcmp.lt.s32.totalorder %v373_v8, 1749  ;;  %vm484_vm5 = vcmp.lt.s32.totalorder %v374_v11, 1749  ;;  %v376_v19 = vadd.s32 %v3325_v3, %v265_v12  ;;  %v267_v20 = vadd.s32 176, %v3323_v2  ;;  %v632_v8 = vld [vmem:[%s3342_s7 + $0x1c0] sm:$0xff]  ;;  %v633_v11 = vld [vmem:[%s3342_s7 + $0x1c8] sm:$0xff] }
  0x2e   : > { %2913 = vmatmul.mubr.msk.f32.gmra.mxu0 %vm1017_vm4, %v913_v43  ;;  %v268_v21 = vadd.s32 184, %v3323_v2  ;;  %v923_v22 = vsel %vm483_vm3, %v593_v15, 0.0  ;;  %v269_v23 = vadd.s32 192, %v3323_v2  ;;  %v270_v24 = vadd.s32 200, %v3323_v2  ;;  %v599_v43 = vld [vmem:[%s3342_s7 + $0xb8] sm:$0xff] }
  0x2f   : > { %2915 = vmatprep.mubr.msk.f32.mxu0 %vm1017_vm4, %v914_v44  ;;  %v924_v25 = vsel %vm484_vm5, %v594_v18, 0.0  ;;  %vm485_vm6 = vcmp.lt.s32.totalorder %v375_v16, 1749  ;;  %v377_v27 = vadd.s32 %v3325_v3, %v266_v17  ;;  %v271_v28 = vadd.s32 208, %v3323_v2 }
  0x30   : > { %vm486_vm7 = vcmp.lt.s32.totalorder %v376_v19, 1749  ;;  %v378_v30 = vadd.s32 %v3325_v3, %v267_v20  ;;  %v379_v31 = vadd.s32 %v3325_v3, %v268_v21  ;;  %v272_v32 = vadd.s32 216, %v3323_v2 }
  0x31   : > { %v273_v33 = vadd.s32 224, %v3323_v2  ;;  %v925_v34 = vsel %vm485_vm6, %v595_v26, 0.0  ;;  %v380_v35 = vadd.s32 %v3325_v3, %v269_v23  ;;  %v381_v36 = vadd.s32 %v3325_v3, %v270_v24  ;;  %v635_v24 = vld [vmem:[%s3342_s7 + $0x1d8] sm:$0xff] }
  0x32   : > { %2916 = vmatmul.mubr.msk.f32.gmra.mxu0 %vm1017_vm4, %v915_v51  ;;  %v274_v37 = vadd.s32 232, %v3323_v2  ;;  %v926_v38 = vsel %vm486_vm7, %v596_v29, 0.0  ;;  %vm487_vm8 = vcmp.lt.s32.totalorder %v377_v27, 1749  ;;  %v382_v40 = vadd.s32 %v3325_v3, %v271_v28  ;;  %v602_v51 = vld [vmem:[%s3342_s7 + $0xd0] sm:$0xff] }
  0x33   : > { %2918 = vmatprep.mubr.msk.f32.mxu0 %vm1017_vm4, %v916_v52  ;;  %v275_v41 = vadd.s32 240, %v3323_v2  ;;  %vm488_vm9 = vcmp.lt.s32.totalorder %v378_v30, 1749  ;;  %vm489_vm10 = vcmp.lt.s32.totalorder %v379_v31, 1749  ;;  %v383_v44 = vadd.s32 %v3325_v3, %v272_v32  ;;  %v636_v31 = vld [vmem:[%s3342_s7 + $0x1e0] sm:$0xff] }
  0x34   : > { %v384_v45 = vadd.s32 %v3325_v3, %v273_v33  ;;  %v927_v46 = vsel %vm487_vm8, %v597_v39, 0.0  ;;  %vm490_vm11 = vcmp.lt.s32.totalorder %v380_v35, 1749  ;;  %vm491_vm12 = vcmp.lt.s32.totalorder %v381_v36, 1749  ;;  %v637_v36 = vld [vmem:[%s3342_s7 + $0x1e8] sm:$0xff]  ;;  %v638_v39 = vld [vmem:[%s3342_s7 + $0x1f0] sm:$0xff] }
  0x35   : > { %v385_v49 = vadd.s32 %v3325_v3, %v274_v37  ;;  %v928_v50 = vsel %vm488_vm9, %v598_v42, 0.0  ;;  %vm492_vm13 = vcmp.lt.s32.totalorder %v382_v40, 1749  ;;  %v386_v52 = vadd.s32 %v3325_v3, %v275_v41 }
  0x36   : > { %2919 = vmatmul.mubr.msk.f32.gmra.mxu0 %vm1017_vm4, %v917_v59  ;;  %v929_v53 = vsel %vm489_vm10, %v599_v43, 0.0  ;;  %v930_v54 = vsel %vm490_vm11, %v600_v47, 0.0  ;;  %v931_v55 = vsel %vm491_vm12, %v601_v48, 0.0  ;;  %vm493_vm14 = vcmp.lt.s32.totalorder %v383_v44, 1749  ;;  %v605_v59 = vld [vmem:[%s3342_s7 + $0xe8] sm:$0xff]  ;;  %v607_v44 = vld [vmem:[%s3342_s7 + $0xf8] sm:$0xff] }
  0x37   : > { %2921 = vmatprep.mubr.msk.f32.mxu0 %vm1017_vm4, %v918_v60  ;;  %vm494_vm15 = vcmp.lt.s32.totalorder %v384_v45, 1749  ;;  %v932_v58 = vsel %vm492_vm13, %v602_v51, 0.0  ;;  %vm495_vm0 = vcmp.lt.s32.totalorder %v385_v49, 1749  ;;  %v276_v60 = vadd.s32 248, %v3323_v2  ;;  %v608_v48 = vld [vmem:[%s3342_s7 + $0x100] sm:$0xff] }
  0x38   : > { %v301_v61 = vadd.s32 448, %v3323_v2  ;;  %vm496_vm1 = vcmp.lt.s32.totalorder %v386_v52, 1749  ;;  %v277_v63 = vadd.s32 256, %v3323_v2  ;;  %v278_v0 = vadd.s32 264, %v3323_v2  ;;  %v640_v52 = vld [vmem:[%s3342_s7 + $0x200] sm:$0xff] }
  0x39   : > { %v302_v1 = vadd.s32 456, %v3323_v2  ;;  %v933_v4 = vsel %vm493_vm14, %v603_v56, 0.0  ;;  %v3457_v9 = vsel %vm495_vm0, %v605_v59, 0.0  ;;  %v303_v12 = vadd.s32 464, %v3323_v2 }
  0x3a   : > { %2922 = vmatmul.mubr.msk.f32.gmra.mxu0 %vm1017_vm4, %v919_v5  ;;  %v934_v5 = vsel %vm494_vm15, %v604_v57, 0.0  ;;  %v412_v7 = vadd.s32 %v3325_v3, %v301_v61  ;;  %v3468_v15 = vadd.s32 %v3325_v3, %v276_v60  ;;  %v280_v16 = vadd.s32 280, %v3323_v2  ;;  %v609_v57 = vld [vmem:[%s3342_s7 + $0x108] sm:$0xff]  ;;  %v610_v60 = vld [vmem:[%s3342_s7 + $0x110] sm:$0xff] }
  0x3b   : > { %2924 = vmatprep.mubr.msk.f32.mxu0 %vm1017_vm4, %v920_v6  ;;  %v279_v6 = vadd.s32 272, %v3323_v2  ;;  %v413_v10 = vadd.s32 %v3325_v3, %v302_v1  ;;  %v3472_v17 = vadd.s32 %v3325_v3, %v277_v63  ;;  %v3475_v18 = vadd.s32 %v3325_v3, %v278_v0  ;;  %v641_v1 = vld [vmem:[%s3342_s7 + $0x208] sm:$0xff] }
  0x3c   : > { %vm522_vm2 = vcmp.lt.s32.totalorder %v412_v7, 1749  ;;  %v414_v21 = vadd.s32 %v3325_v3, %v303_v12  ;;  %v306_v26 = vadd.s32 488, %v3323_v2  ;;  %v307_v27 = vadd.s32 496, %v3323_v2  ;;  %v642_v7 = vld [vmem:[%s3342_s7 + $0x210] sm:$0xff] }
  0x3d   : > { %v962_v19 = vsel %vm522_vm2, %v632_v8, 0.0  ;;  %vm523_vm3 = vcmp.lt.s32.totalorder %v413_v10, 1749  ;;  %v308_v28 = vadd.s32 504, %v3323_v2  ;;  %v309_v29 = vadd.s32 512, %v3323_v2 }
  0x3e   : > { %2925 = vmatmul.mubr.msk.f32.gmra.mxu0 %vm1017_vm4, %v921_v13  ;;  %v304_v13 = vadd.s32 472, %v3323_v2  ;;  %2987 = vmatprep.mubr.msk.f32.mxu1 %vm1017_vm4, %v962_v19  ;;  %v963_v20 = vsel %vm523_vm3, %v633_v11, 0.0  ;;  %vm524_vm5 = vcmp.lt.s32.totalorder %v414_v21, 1749  ;;  %v310_v32 = vadd.s32 520, %v3323_v2  ;;  %v611_v11 = vld [vmem:[%s3342_s7 + $0x118] sm:$0xff] }
  0x3f   : > { %2927 = vmatprep.mubr.msk.f32.mxu0 %vm1017_vm4, %v922_v14  ;;  %v3465_v14 = vsel %vm496_vm1, %v606_v62, 0.0  ;;  %2988 = vmatmul.mubr.msk.f32.vlgmr.msra.gmra.mxu1 %vm1017_vm4, %v963_v20  ;;  %v417_v35 = vadd.s32 %v3325_v3, %v306_v26  ;;  %v418_v37 = vadd.s32 %v3325_v3, %v307_v27  ;;  %v419_v40 = vadd.s32 %v3325_v3, %v308_v28  ;;  %v643_v19 = vld [vmem:[%s3342_s7 + $0x218] sm:$0xff] }
  0x40   : > { %v415_v23 = vadd.s32 %v3325_v3, %v304_v13  ;;  %v420_v41 = vadd.s32 %v3325_v3, %v309_v29  ;;  %v311_v43 = vadd.s32 528, %v3323_v2  ;;  %vm497_vm10 = vcmp.lt.s32.totalorder %v3468_v15, 1749  ;;  %v613_v29 = vld [vmem:[%s3342_s7 + $0x128] sm:$0xff] }
  0x41   : > { %vm527_vm8 = vcmp.lt.s32.totalorder %v417_v35, 1749  ;;  %vm528_vm9 = vcmp.lt.s32.totalorder %v418_v37, 1749  ;;  %v391_v45 = vadd.s32 %v3325_v3, %v280_v16  ;;  %vm498_vm11 = vcmp.lt.s32.totalorder %v3472_v17, 1749  ;;  %v645_v35 = vld [vmem:[%s3342_s7 + $0x228] sm:$0xff] }
  0x42   : > { %2928 = vmatmul.mubr.msk.f32.gmra.mxu0 %vm1017_vm4, %v923_v22  ;;  %v634_v22 = vld [vmem:[%s3342_s7 + $0x1d0] sm:$0xff]  ;;  %vm525_vm6 = vcmp.lt.s32.totalorder %v415_v23, 1749  ;;  %v967_v47 = vsel %vm527_vm8, %v637_v36, 0.0  ;;  %v968_v49 = vsel %vm528_vm9, %v638_v39, 0.0  ;;  %vm529_vm12 = vcmp.lt.s32.totalorder %v419_v40, 1749  ;;  %v644_v23 = vld [vmem:[%s3342_s7 + $0x220] sm:$0xff] }
  0x43   : > { %2930 = vmatprep.mubr.msk.f32.mxu0 %vm1017_vm4, %v924_v25  ;;  %v305_v25 = vadd.s32 480, %v3323_v2  ;;  %v964_v33 = vsel %vm524_vm5, %v634_v22, 0.0  ;;  %v421_v51 = vadd.s32 %v3325_v3, %v310_v32  ;;  %vm530_vm13 = vcmp.lt.s32.totalorder %v420_v41, 1749  ;;  %v646_v39 = vld [vmem:[%s3342_s7 + $0x230] sm:$0xff] }
  0x44   : > { %2990 = vmatprep.mubr.msk.f32.mxu1 %vm1017_vm4, %v964_v33  ;;  %v937_v56 = vsel %vm497_vm10, %v607_v44, 0.0  ;;  %vm499_vm14 = vcmp.lt.s32.totalorder %v3475_v18, 1749  ;;  %v938_v59 = vsel %vm498_vm11, %v608_v48, 0.0  ;;  %v283_v62 = vadd.s32 304, %v3323_v2  ;;  %v614_v33 = vld [vmem:[%s3342_s7 + $0x130] sm:$0xff]  ;;  %v616_v48 = vld [vmem:[%s3342_s7 + $0x140] sm:$0xff] }
  0x45   : > { %v416_v30 = vadd.s32 %v3325_v3, %v305_v25  ;;  %v970_v0 = vsel %vm530_vm13, %v640_v52, 0.0  ;;  %vm531_vm0 = vcmp.lt.s32.totalorder %v421_v51, 1749  ;;  %vm501_vm2 = vcmp.lt.s32.totalorder %v391_v45, 1749  ;;  %v647_v51 = vld [vmem:[%s3342_s7 + $0x238] sm:$0xff] }
  0x46   : > { %2931 = vmatmul.mubr.msk.f32.gmra.mxu0 %vm1017_vm4, %v925_v34  ;;  %v965_v34 = vsel %vm525_vm6, %v635_v24, 0.0  ;;  %v284_v13 = vadd.s32 312, %v3323_v2  ;;  %v394_v15 = vadd.s32 %v3325_v3, %v283_v62  ;;  %v285_v16 = vadd.s32 320, %v3323_v2  ;;  %v618_v62 = vld [vmem:[%s3342_s7 + $0x150] sm:$0xff] }
  0x47   : > { %2933 = vmatprep.mubr.msk.f32.mxu0 %vm1017_vm4, %v926_v38  ;;  %v390_v38 = vadd.s32 %v3325_v3, %v279_v6  ;;  %vm526_vm7 = vcmp.lt.s32.totalorder %v416_v30, 1749  ;;  %2991 = vmatmul.mubr.msk.f32.gmra.mxu1 %vm1017_vm4, %v965_v34  ;;  %v939_v6 = vsel %vm499_vm14, %v609_v57, 0.0  ;;  %v971_v17 = vsel %vm531_vm0, %v641_v1, 0.0 }
  0x48   : > { %v966_v42 = vsel %vm526_vm7, %v636_v31, 0.0  ;;  %v316_v21 = vadd.s32 568, %v3323_v2  ;;  %v941_v22 = vsel %vm501_vm2, %v611_v11, 0.0  ;;  %v317_v25 = vadd.s32 576, %v3323_v2 }
  0x49   : > { %2993 = vmatprep.mubr.msk.f32.mxu1 %vm1017_vm4, %v966_v42  ;;  %vm500_vm15 = vcmp.lt.s32.totalorder %v390_v38, 1749  ;;  %v286_v27 = vadd.s32 328, %v3323_v2  ;;  %v287_v28 = vadd.s32 336, %v3323_v2  ;;  %vm504_vm8 = vcmp.lt.s32.totalorder %v394_v15, 1749  ;;  %v620_v15 = vld [vmem:[%s3342_s7 + $0x160] sm:$0xff] }
  0x4a   : > { %2934 = vmatmul.mubr.msk.f32.gmra.mxu0 %vm1017_vm4, %v927_v46  ;;  %v281_v46 = vadd.s32 288, %v3323_v2  ;;  %v940_v10 = vsel %vm500_vm15, %v610_v60, 0.0  ;;  %v395_v30 = vadd.s32 %v3325_v3, %v284_v13  ;;  %v396_v31 = vadd.s32 %v3325_v3, %v285_v16  ;;  %v617_v60 = vld [vmem:[%s3342_s7 + $0x148] sm:$0xff] }
  0x4b   : > { %2936 = vmatprep.mubr.msk.f32.mxu0 %vm1017_vm4, %v928_v50  ;;  %v639_v50 = vld [vmem:[%s3342_s7 + $0x1f8] sm:$0xff]  ;;  %2994 = vmatmul.mubr.msk.f32.gmra.mxu1 %vm1017_vm4, %v967_v47  ;;  %v427_v36 = vadd.s32 %v3325_v3, %v316_v21  ;;  %v318_v37 = vadd.s32 584, %v3323_v2  ;;  %v288_v38 = vadd.s32 344, %v3323_v2  ;;  %v428_v40 = vadd.s32 %v3325_v3, %v317_v25  ;;  %v652_v25 = vld [vmem:[%s3342_s7 + $0x260] sm:$0xff] }
  0x4c   : > { %v392_v61 = vadd.s32 %v3325_v3, %v281_v46  ;;  %2996 = vmatprep.mubr.msk.f32.mxu1 %vm1017_vm4, %v968_v49  ;;  %v969_v63 = vsel %vm529_vm12, %v639_v50, 0.0  ;;  %v319_v41 = vadd.s32 592, %v3323_v2  ;;  %v398_v44 = vadd.s32 %v3325_v3, %v287_v28  ;;  %v615_v47 = vld [vmem:[%s3342_s7 + $0x138] sm:$0xff] }
  0x4d   : > { %v289_v45 = vadd.s32 352, %v3323_v2  ;;  %v944_v46 = vsel %vm504_vm8, %v614_v33, 0.0  ;;  %vm505_vm11 = vcmp.lt.s32.totalorder %v395_v30, 1749  ;;  %vm506_vm12 = vcmp.lt.s32.totalorder %v396_v31, 1749  ;;  %v651_v21 = vld [vmem:[%s3342_s7 + $0x258] sm:$0xff] }
  0x4e   : > { %2937 = vmatmul.mubr.msk.f32.gmra.mxu0 %vm1017_vm4, %v929_v53  ;;  %v422_v53 = vadd.s32 %v3325_v3, %v311_v43  ;;  %vm502_vm3 = vcmp.lt.s32.totalorder %v392_v61, 1749  ;;  %v397_v43 = vadd.s32 %v3325_v3, %v286_v27  ;;  %vm537_vm13 = vcmp.lt.s32.totalorder %v427_v36, 1749 }
  0x4f   : > { %2939 = vmatprep.mubr.msk.f32.mxu0 %vm1017_vm4, %v930_v54  ;;  %v312_v54 = vadd.s32 536, %v3323_v2  ;;  %2997 = vmatmul.mubr.msk.f32.gmra.mxu1 %vm1017_vm4, %v969_v63  ;;  %v429_v52 = vadd.s32 %v3325_v3, %v318_v37  ;;  %vm538_vm14 = vcmp.lt.s32.totalorder %v428_v40, 1749  ;;  %v321_v57 = vadd.s32 608, %v3323_v2  ;;  %v653_v37 = vld [vmem:[%s3342_s7 + $0x268] sm:$0xff] }
  0x50   : > { %vm532_vm1 = vcmp.lt.s32.totalorder %v422_v53, 1749  ;;  %2999 = vmatprep.mubr.msk.f32.mxu1 %vm1017_vm4, %v970_v0  ;;  %v320_v53 = vadd.s32 600, %v3323_v2  ;;  %vm507_vm15 = vcmp.lt.s32.totalorder %v397_v43, 1749  ;;  %v400_v61 = vadd.s32 %v3325_v3, %v289_v45 }
  0x51   : > { %v972_v18 = vsel %vm532_vm1, %v642_v7, 0.0  ;;  %vm508_vm0 = vcmp.lt.s32.totalorder %v398_v44, 1749  ;;  %v290_v63 = vadd.s32 360, %v3323_v2  ;;  %v291_v0 = vadd.s32 368, %v3323_v2  ;;  %v623_v44 = vld [vmem:[%s3342_s7 + $0x178] sm:$0xff] }
  0x52   : > { %2940 = vmatmul.mubr.msk.f32.gmra.mxu0 %vm1017_vm4, %v931_v55  ;;  %v313_v55 = vadd.s32 544, %v3323_v2  ;;  %v977_v1 = vsel %vm537_vm13, %v647_v51, 0.0  ;;  %vm539_vm1 = vcmp.lt.s32.totalorder %v429_v52, 1749  ;;  %v322_v7 = vadd.s32 616, %v3323_v2 }
  0x53   : > { %2942 = vmatprep.mubr.msk.f32.mxu0 %vm1017_vm4, %v932_v58  ;;  %v282_v58 = vadd.s32 296, %v3323_v2  ;;  %3000 = vmatmul.mubr.msk.f32.gmra.mxu1 %vm1017_vm4, %v971_v17  ;;  %v323_v11 = vadd.s32 624, %v3323_v2  ;;  %v292_v13 = vadd.s32 376, %v3323_v2  ;;  %v401_v16 = vadd.s32 %v3325_v3, %v290_v63  ;;  %v626_v63 = vld [vmem:[%s3342_s7 + $0x190] sm:$0xff] }
  0x54   : > { %v424_v8 = vadd.s32 %v3325_v3, %v313_v55  ;;  %3002 = vmatprep.mubr.msk.f32.mxu1 %vm1017_vm4, %v972_v18  ;;  %v648_v55 = vld [vmem:[%s3342_s7 + $0x240] sm:$0xff]  ;;  %v402_v17 = vadd.s32 %v3325_v3, %v291_v0  ;;  %v293_v18 = vadd.s32 384, %v3323_v2  ;;  %v325_v27 = vadd.s32 640, %v3323_v2 }
  0x55   : > { %v393_v12 = vadd.s32 %v3325_v3, %v282_v58  ;;  %v945_v58 = vsel %vm505_vm11, %v615_v47, 0.0  ;;  %v403_v30 = vadd.s32 %v3325_v3, %v292_v13  ;;  %v295_v31 = vadd.s32 400, %v3323_v2 }
  0x56   : > { %2943 = vmatmul.mubr.msk.f32.gmra.mxu0 %vm1017_vm4, %v933_v4  ;;  %v423_v4 = vadd.s32 %v3325_v3, %v312_v54  ;;  %vm534_vm6 = vcmp.lt.s32.totalorder %v424_v8, 1749  ;;  %v399_v54 = vadd.s32 %v3325_v3, %v288_v38  ;;  %v947_v8 = vsel %vm507_vm15, %v617_v60, 0.0 }
  0x57   : > { %2945 = vmatprep.mubr.msk.f32.mxu0 %vm1017_vm4, %v934_v5  ;;  %v314_v5 = vadd.s32 552, %v3323_v2  ;;  %vm503_vm7 = vcmp.lt.s32.totalorder %v393_v12, 1749  ;;  %v974_v34 = vsel %vm534_vm6, %v644_v23, 0.0  ;;  %v948_v12 = vsel %vm508_vm0, %v618_v62, 0.0  ;;  %v625_v62 = vld [vmem:[%s3342_s7 + $0x188] sm:$0xff] }
  0x58   : > { %vm533_vm5 = vcmp.lt.s32.totalorder %v423_v4, 1749  ;;  %v943_v42 = vsel %vm503_vm7, %v613_v29, 0.0  ;;  %v978_v4 = vsel %vm538_vm14, %v648_v55, 0.0  ;;  %v324_v23 = vadd.s32 632, %v3323_v2 }
  0x59   : > { %v425_v20 = vadd.s32 %v3325_v3, %v314_v5  ;;  %v973_v32 = vsel %vm533_vm5, %v643_v19, 0.0  ;;  %v649_v5 = vld [vmem:[%s3342_s7 + $0x248] sm:$0xff]  ;;  %vm510_vm5 = vcmp.lt.s32.totalorder %v400_v61, 1749  ;;  %vm511_vm8 = vcmp.lt.s32.totalorder %v401_v16, 1749  ;;  %v627_v16 = vld [vmem:[%s3342_s7 + $0x198] sm:$0xff] }
  0x5a   : > { %2946 = vmatmul.mubr.msk.f32.gmra.mxu0 %vm1017_vm4, %v3457_v9  ;;  %v315_v9 = vadd.s32 560, %v3323_v2  ;;  %3003 = vmatmul.mubr.msk.f32.gmra.mxu1 %vm1017_vm4, %v973_v32  ;;  %v979_v19 = vsel %vm539_vm1, %v649_v5, 0.0  ;;  %v950_v29 = vsel %vm510_vm5, %v620_v15, 0.0  ;;  %v404_v32 = vadd.s32 %v3325_v3, %v293_v18 }
  0x5b   : > { %2948 = vmatprep.mubr.msk.f32.mxu0 %vm1017_vm4, %v3465_v14  ;;  %v612_v14 = vld [vmem:[%s3342_s7 + $0x120] sm:$0xff]  ;;  %vm535_vm9 = vcmp.lt.s32.totalorder %v425_v20, 1749  ;;  %3005 = vmatprep.mubr.msk.f32.mxu1 %vm1017_vm4, %v974_v34  ;;  %v621_v34 = vld [vmem:[%s3342_s7 + $0x168] sm:$0xff]  ;;  %v435_v38 = vadd.s32 %v3325_v3, %v324_v23  ;;  %v327_v43 = vadd.s32 656, %v3323_v2  ;;  %v406_v45 = vadd.s32 %v3325_v3, %v295_v31 }
  0x5c   : > { %v426_v24 = vadd.s32 %v3325_v3, %v315_v9  ;;  %v942_v26 = vsel %vm502_vm3, %v612_v14, 0.0  ;;  %v975_v49 = vsel %vm535_vm9, %v645_v35, 0.0  ;;  %v650_v9 = vld [vmem:[%s3342_s7 + $0x250] sm:$0xff]  ;;  %vm509_vm3 = vcmp.lt.s32.totalorder %v399_v54, 1749  ;;  %v619_v14 = vld [vmem:[%s3342_s7 + $0x158] sm:$0xff] }
  0x5d   : > { %v949_v28 = vsel %vm509_vm3, %v619_v14, 0.0  ;;  %vm512_vm9 = vcmp.lt.s32.totalorder %v402_v17, 1749  ;;  %v622_v35 = vld [vmem:[%s3342_s7 + $0x170] sm:$0xff]  ;;  %v297_v47 = vadd.s32 416, %v3323_v2  ;;  %vm514_vm13 = vcmp.lt.s32.totalorder %v404_v32, 1749  ;;  %v628_v17 = vld [vmem:[%s3342_s7 + $0x1a0] sm:$0xff] }
  0x5e   : > { %2949 = vmatmul.mubr.msk.f32.gmra.mxu0 %vm1017_vm4, %v937_v56  ;;  %vm536_vm10 = vcmp.lt.s32.totalorder %v426_v24, 1749  ;;  %v430_v56 = vadd.s32 %v3325_v3, %v319_v41  ;;  %3006 = vmatmul.mubr.msk.f32.gmra.mxu1 %vm1017_vm4, %v975_v49  ;;  %v294_v24 = vadd.s32 392, %v3323_v2  ;;  %v654_v41 = vld [vmem:[%s3342_s7 + $0x270] sm:$0xff]  ;;  %v952_v49 = vsel %vm512_vm9, %v622_v35, 0.0  ;;  %v629_v32 = vld [vmem:[%s3342_s7 + $0x1a8] sm:$0xff] }
  0x5f   : > { %2951 = vmatprep.mubr.msk.f32.mxu0 %vm1017_vm4, %v938_v59  ;;  %v976_v50 = vsel %vm536_vm10, %v646_v39, 0.0  ;;  %v946_v59 = vsel %vm506_vm12, %v616_v48, 0.0  ;;  %v326_v39 = vadd.s32 648, %v3323_v2  ;;  %vm513_vm12 = vcmp.lt.s32.totalorder %v403_v30, 1749  ;;  %v661_v35 = vld [vmem:[%s3342_s7 + $0x2a8] sm:$0xff] }
  0x60   : > { %3008 = vmatprep.mubr.msk.f32.mxu1 %vm1017_vm4, %v976_v50  ;;  %vm540_vm2 = vcmp.lt.s32.totalorder %v430_v56, 1749  ;;  %v405_v40 = vadd.s32 %v3325_v3, %v294_v24  ;;  %v951_v48 = vsel %vm511_vm8, %v621_v34, 0.0  ;;  %v624_v50 = vld [vmem:[%s3342_s7 + $0x180] sm:$0xff]  ;;  %vm545_vm14 = vcmp.lt.s32.totalorder %v435_v38, 1749  ;;  %v662_v38 = vld [vmem:[%s3342_s7 + $0x2b0] sm:$0xff] }
  0x61   : > { %v980_v20 = vsel %vm540_vm2, %v650_v9, 0.0  ;;  %v437_v54 = vadd.s32 %v3325_v3, %v326_v39  ;;  %v328_v55 = vadd.s32 664, %v3323_v2  ;;  %v953_v56 = vsel %vm513_vm12, %v623_v44, 0.0  ;;  %v631_v44 = vld [vmem:[%s3342_s7 + $0x1b8] sm:$0xff] }
  0x62   : > { %2952 = vmatmul.mubr.msk.f32.gmra.mxu0 %vm1017_vm4, %v939_v6  ;;  %v431_v6 = vadd.s32 %v3325_v3, %v320_v53  ;;  %3009 = vmatmul.mubr.msk.f32.gmra.mxu1 %vm1017_vm4, %v977_v1  ;;  %v655_v53 = vld [vmem:[%s3342_s7 + $0x278] sm:$0xff]  ;;  %v954_v60 = vsel %vm514_vm13, %v624_v50, 0.0  ;;  %vm515_vm0 = vcmp.lt.s32.totalorder %v405_v40, 1749  ;;  %vm516_vm1 = vcmp.lt.s32.totalorder %v406_v45, 1749 }
  0x63   : > { %2954 = vmatprep.mubr.msk.f32.mxu0 %vm1017_vm4, %v940_v10  ;;  %v432_v10 = vadd.s32 %v3325_v3, %v321_v57  ;;  %3011 = vmatprep.mubr.msk.f32.mxu1 %vm1017_vm4, %v978_v4  ;;  %v656_v57 = vld [vmem:[%s3342_s7 + $0x280] sm:$0xff]  ;;  %v408_v0 = vadd.s32 %v3325_v3, %v297_v47  ;;  %v298_v1 = vadd.s32 424, %v3323_v2  ;;  %v299_v4 = vadd.s32 432, %v3323_v2 }
  0x64   : > { %vm541_vm6 = vcmp.lt.s32.totalorder %v431_v6, 1749  ;;  %v985_v5 = vsel %vm545_vm14, %v655_v53, 0.0  ;;  %vm547_vm2 = vcmp.lt.s32.totalorder %v437_v54, 1749  ;;  %v330_v9 = vadd.s32 680, %v3323_v2 }
  0x65   : > { %vm542_vm7 = vcmp.lt.s32.totalorder %v432_v10, 1749  ;;  %v981_v33 = vsel %vm541_vm6, %v651_v21, 0.0  ;;  %v658_v10 = vld [vmem:[%s3342_s7 + $0x290] sm:$0xff]  ;;  %v955_v13 = vsel %vm515_vm0, %v625_v62, 0.0  ;;  %v956_v14 = vsel %vm516_vm1, %v626_v63, 0.0  ;;  %v667_v63 = vld [vmem:[%s3342_s7 + $0x2d8] sm:$0xff] }
  0x66   : > { %2955 = vmatmul.mubr.msk.f32.gmra.mxu0 %vm1017_vm4, %v941_v22  ;;  %v433_v22 = vadd.s32 %v3325_v3, %v322_v7  ;;  %3012 = vmatmul.mubr.msk.f32.gmra.mxu1 %vm1017_vm4, %v979_v19  ;;  %v982_v36 = vsel %vm542_vm7, %v652_v25, 0.0  ;;  %v657_v7 = vld [vmem:[%s3342_s7 + $0x288] sm:$0xff]  ;;  %v300_v15 = vadd.s32 440, %v3323_v2  ;;  %vm518_vm6 = vcmp.lt.s32.totalorder %v408_v0, 1749  ;;  %v660_v25 = vld [vmem:[%s3342_s7 + $0x2a0] sm:$0xff] }
  0x67   : > { %2957 = vmatprep.mubr.msk.f32.mxu0 %vm1017_vm4, %v942_v26  ;;  %v434_v26 = vadd.s32 %v3325_v3, %v323_v11  ;;  %3014 = vmatprep.mubr.msk.f32.mxu1 %vm1017_vm4, %v980_v20  ;;  %v409_v18 = vadd.s32 %v3325_v3, %v298_v1  ;;  %v410_v19 = vadd.s32 %v3325_v3, %v299_v4  ;;  %v987_v20 = vsel %vm547_vm2, %v657_v7, 0.0  ;;  %v668_v4 = vld [vmem:[%s3342_s7 + $0x2e0] sm:$0xff] }
  0x68   : > { %vm543_vm10 = vcmp.lt.s32.totalorder %v433_v22, 1749  ;;  %v659_v22 = vld [vmem:[%s3342_s7 + $0x298] sm:$0xff]  ;;  %v441_v23 = vadd.s32 %v3325_v3, %v330_v9  ;;  %v332_v24 = vadd.s32 696, %v3323_v2  ;;  %v411_v30 = vadd.s32 %v3325_v3, %v300_v15  ;;  %v669_v9 = vld [vmem:[%s3342_s7 + $0x2e8] sm:$0xff] }
  0x69   : > { %vm544_vm11 = vcmp.lt.s32.totalorder %v434_v26, 1749  ;;  %v983_v51 = vsel %vm543_vm10, %v653_v37, 0.0  ;;  %vm519_vm9 = vcmp.lt.s32.totalorder %v409_v18, 1749  ;;  %vm520_vm10 = vcmp.lt.s32.totalorder %v410_v19, 1749 }
  0x6a   : > { %2958 = vmatmul.mubr.msk.f32.gmra.mxu0 %vm1017_vm4, %v943_v42  ;;  %v436_v42 = vadd.s32 %v3325_v3, %v325_v27  ;;  %3015 = vmatmul.mubr.msk.f32.gmra.mxu1 %vm1017_vm4, %v981_v33  ;;  %v984_v52 = vsel %vm544_vm11, %v654_v41, 0.0  ;;  %v333_v27 = vadd.s32 704, %v3323_v2  ;;  %v630_v33 = vld [vmem:[%s3342_s7 + $0x1b0] sm:$0xff]  ;;  %vm551_vm11 = vcmp.lt.s32.totalorder %v441_v23, 1749 }
  0x6b   : > { %2960 = vmatprep.mubr.msk.f32.mxu0 %vm1017_vm4, %v944_v46  ;;  %v296_v46 = vadd.s32 408, %v3323_v2  ;;  %3017 = vmatprep.mubr.msk.f32.mxu1 %vm1017_vm4, %v982_v36  ;;  %v443_v36 = vadd.s32 %v3325_v3, %v332_v24  ;;  %v334_v37 = vadd.s32 712, %v3323_v2  ;;  %v335_v40 = vadd.s32 720, %v3323_v2 }
  0x6c   : > { %vm546_vm15 = vcmp.lt.s32.totalorder %v436_v42, 1749  ;;  %v444_v39 = vadd.s32 %v3325_v3, %v333_v27  ;;  %v959_v41 = vsel %vm519_vm9, %v629_v32, 0.0  ;;  %v960_v42 = vsel %vm520_vm10, %v630_v33, 0.0  ;;  %v675_v33 = vld [vmem:[%s3342_s7 + $0x318] sm:$0xff] }
  0x6d   : > { %v407_v61 = vadd.s32 %v3325_v3, %v296_v46  ;;  %v986_v6 = vsel %vm546_vm15, %v656_v57, 0.0  ;;  %vm521_vm13 = vcmp.lt.s32.totalorder %v411_v30, 1749  ;;  %vm553_vm14 = vcmp.lt.s32.totalorder %v443_v36, 1749  ;;  %v663_v46 = vld [vmem:[%s3342_s7 + $0x2b8] sm:$0xff]  ;;  %v676_v36 = vld [vmem:[%s3342_s7 + $0x320] sm:$0xff] }
  0x6e   : > { %2961 = vmatmul.mubr.msk.f32.gmra.mxu0 %vm1017_vm4, %v945_v58  ;;  %v438_v58 = vadd.s32 %v3325_v3, %v327_v43  ;;  %3018 = vmatmul.mubr.msk.f32.gmra.mxu1 %vm1017_vm4, %v983_v51  ;;  %v991_v43 = vsel %vm551_vm11, %v661_v35, 0.0  ;;  %v445_v47 = vadd.s32 %v3325_v3, %v334_v37  ;;  %vm554_vm15 = vcmp.lt.s32.totalorder %v444_v39, 1749 }
  0x6f   : > { %2963 = vmatprep.mubr.msk.f32.mxu0 %vm1017_vm4, %v946_v59  ;;  %v329_v59 = vadd.s32 672, %v3323_v2  ;;  %3020 = vmatprep.mubr.msk.f32.mxu1 %vm1017_vm4, %v984_v52  ;;  %vm517_vm5 = vcmp.lt.s32.totalorder %v407_v61, 1749  ;;  %v446_v50 = vadd.s32 %v3325_v3, %v335_v40  ;;  %v337_v51 = vadd.s32 736, %v3323_v2 }
  0x70   : > { %vm548_vm3 = vcmp.lt.s32.totalorder %v438_v58, 1749  ;;  %v961_v52 = vsel %vm521_vm13, %v631_v44, 0.0  ;;  %v993_v53 = vsel %vm553_vm14, %v663_v46, 0.0  ;;  %vm555_vm0 = vcmp.lt.s32.totalorder %v445_v47, 1749  ;;  %v666_v58 = vld [vmem:[%s3342_s7 + $0x2d0] sm:$0xff] }
  0x71   : > { %v440_v11 = vadd.s32 %v3325_v3, %v329_v59  ;;  %v988_v21 = vsel %vm548_vm3, %v658_v10, 0.0  ;;  %v338_v57 = vadd.s32 744, %v3323_v2  ;;  %vm556_vm1 = vcmp.lt.s32.totalorder %v446_v50, 1749  ;;  %v678_v44 = vld [vmem:[%s3342_s7 + $0x330] sm:$0xff] }
  0x72   : > { %2964 = vmatmul.mubr.msk.f32.gmra.mxu0 %vm1017_vm4, %v947_v8  ;;  %v439_v8 = vadd.s32 %v3325_v3, %v328_v55  ;;  %3021 = vmatmul.mubr.msk.f32.gmra.mxu1 %vm1017_vm4, %v985_v5  ;;  %v665_v55 = vld [vmem:[%s3342_s7 + $0x2c8] sm:$0xff]  ;;  %v448_v59 = vadd.s32 %v3325_v3, %v337_v51  ;;  %v996_v62 = vsel %vm556_vm1, %v666_v58, 0.0  ;;  %v340_v1 = vadd.s32 760, %v3323_v2 }
  0x73   : > { %2966 = vmatprep.mubr.msk.f32.mxu0 %vm1017_vm4, %v948_v12  ;;  %v331_v12 = vadd.s32 688, %v3323_v2  ;;  %3023 = vmatprep.mubr.msk.f32.mxu1 %vm1017_vm4, %v986_v6  ;;  %vm550_vm8 = vcmp.lt.s32.totalorder %v440_v11, 1749  ;;  %v995_v61 = vsel %vm555_vm0, %v665_v55, 0.0  ;;  %v449_v0 = vadd.s32 %v3325_v3, %v338_v57  ;;  %v681_v57 = vld [vmem:[%s3342_s7 + $0x348] sm:$0xff] }
  0x74   : > { %vm549_vm7 = vcmp.lt.s32.totalorder %v439_v8, 1749  ;;  %v990_v34 = vsel %vm550_vm8, %v660_v25, 0.0  ;;  %vm558_vm3 = vcmp.lt.s32.totalorder %v448_v59, 1749  ;;  %v341_v6 = vadd.s32 768, %v3323_v2  ;;  %v673_v25 = vld [vmem:[%s3342_s7 + $0x308] sm:$0xff] }
  0x75   : > { %v442_v26 = vadd.s32 %v3325_v3, %v331_v12  ;;  %v989_v31 = vsel %vm549_vm7, %v659_v22, 0.0  ;;  %v998_v8 = vsel %vm558_vm3, %v668_v4, 0.0  ;;  %v451_v10 = vadd.s32 %v3325_v3, %v340_v1  ;;  %v670_v12 = vld [vmem:[%s3342_s7 + $0x2f0] sm:$0xff]  ;;  %v684_v4 = vld [vmem:[%s3342_s7 + $0x360] sm:$0xff] }
  0x76   : > { %2967 = vmatmul.mubr.msk.f32.gmra.mxu0 %vm1017_vm4, %v949_v28  ;;  %v957_v28 = vsel %vm517_vm5, %v627_v16, 0.0  ;;  %3024 = vmatmul.mubr.msk.f32.gmra.mxu1 %vm1017_vm4, %v987_v20  ;;  %vm559_vm5 = vcmp.lt.s32.totalorder %v449_v0, 1749  ;;  %v342_v11 = vadd.s32 776, %v3323_v2  ;;  %v344_v19 = vadd.s32 792, %v3323_v2  ;;  %v672_v20 = vld [vmem:[%s3342_s7 + $0x300] sm:$0xff]  ;;  %v683_v0 = vld [vmem:[%s3342_s7 + $0x358] sm:$0xff] }
  0x77   : > { %2969 = vmatprep.mubr.msk.f32.mxu0 %vm1017_vm4, %v950_v29  ;;  %v958_v29 = vsel %vm518_vm6, %v628_v17, 0.0  ;;  %3026 = vmatprep.mubr.msk.f32.mxu1 %vm1017_vm4, %v988_v21  ;;  %vm552_vm12 = vcmp.lt.s32.totalorder %v442_v26, 1749  ;;  %v999_v15 = vsel %vm559_vm5, %v669_v9, 0.0  ;;  %vm561_vm7 = vcmp.lt.s32.totalorder %v451_v10, 1749  ;;  %v671_v17 = vld [vmem:[%s3342_s7 + $0x2f8] sm:$0xff] }
  0x78   : > { %v992_v45 = vsel %vm552_vm12, %v662_v38, 0.0  ;;  %v453_v18 = vadd.s32 %v3325_v3, %v342_v11  ;;  %v345_v22 = vadd.s32 800, %v3323_v2  ;;  %v1001_v23 = vsel %vm561_vm7, %v671_v17, 0.0 }
  0x79   : > { %v455_v26 = vadd.s32 %v3325_v3, %v344_v19  ;;  %v346_v27 = vadd.s32 808, %v3323_v2  ;;  %v347_v30 = vadd.s32 816, %v3323_v2  ;;  %v348_v35 = vadd.s32 824, %v3323_v2 }
  0x7a   : > { %2970 = vmatmul.mubr.msk.f32.gmra.mxu0 %vm1017_vm4, %v951_v48  ;;  %3027 = vmatmul.mubr.msk.f32.gmra.mxu1 %vm1017_vm4, %v989_v31  ;;  %v336_v48 = vadd.s32 728, %v3323_v2  ;;  %vm563_vm9 = vcmp.lt.s32.totalorder %v453_v18, 1749  ;;  %v349_v38 = vadd.s32 832, %v3323_v2  ;;  %v351_v46 = vadd.s32 848, %v3323_v2 }
  0x7b   : > { %2972 = vmatprep.mubr.msk.f32.mxu0 %vm1017_vm4, %v952_v49  ;;  %3029 = vmatprep.mubr.msk.f32.mxu1 %vm1017_vm4, %v990_v34  ;;  %v664_v49 = vld [vmem:[%s3342_s7 + $0x2c0] sm:$0xff]  ;;  %v1003_v31 = vsel %vm563_vm9, %v673_v25, 0.0  ;;  %vm565_vm11 = vcmp.lt.s32.totalorder %v455_v26, 1749  ;;  %v457_v34 = vadd.s32 %v3325_v3, %v346_v27  ;;  %v458_v37 = vadd.s32 %v3325_v3, %v347_v30 }
  0x7c   : > { %v994_v54 = vsel %vm554_vm15, %v664_v49, 0.0  ;;  %v1005_v39 = vsel %vm565_vm11, %v675_v33, 0.0  ;;  %v679_v49 = vld [vmem:[%s3342_s7 + $0x338] sm:$0xff]  ;;  %v352_v51 = vadd.s32 856, %v3323_v2  ;;  %v354_v59 = vadd.s32 872, %v3323_v2 }
  0x7d   : > { %vm567_vm13 = vcmp.lt.s32.totalorder %v457_v34, 1749  ;;  %vm568_vm14 = vcmp.lt.s32.totalorder %v458_v37, 1749  ;;  %vm239_vm7 = vcmask 261120  }
  0x7e   : > { %2973 = vmatmul.mubr.msk.f32.gmra.mxu0 %vm1017_vm4, %v953_v56  ;;  %3030 = vmatmul.mubr.msk.f32.gmra.mxu1 %vm1017_vm4, %v991_v43  ;;  %v447_v56 = vadd.s32 %v3325_v3, %v336_v48  ;;  %v350_v43 = vadd.s32 840, %v3323_v2  ;;  %v1008_v48 = vsel %vm568_vm14, %v678_v44, 0.0  ;;  %v463_v58 = vadd.s32 %v3325_v3, %v352_v51 }
  0x7f   : > { %2975 = vmatprep.mubr.msk.f32.mxu0 %vm1017_vm4, %v954_v60  ;;  %3032 = vmatprep.mubr.msk.f32.mxu1 %vm1017_vm4, %v992_v45  ;;  %v339_v60 = vadd.s32 752, %v3323_v2  ;;  %v460_v45 = vadd.s32 %v3325_v3, %v349_v38  ;;  %v465_v1 = vadd.s32 %v3325_v3, %v354_v59 }
  0x80   : > { %vm557_vm2 = vcmp.lt.s32.totalorder %v447_v56, 1749  ;;  %v461_v50 = vadd.s32 %v3325_v3, %v350_v43  ;;  %vm573_vm3 = vcmp.lt.s32.totalorder %v463_v58, 1749 }
  0x81   : > { %v450_v5 = vadd.s32 %v3325_v3, %v339_v60  ;;  %v997_v7 = vsel %vm557_vm2, %v667_v63, 0.0  ;;  %vm570_vm0 = vcmp.lt.s32.totalorder %v460_v45, 1749  ;;  %v682_v60 = vld [vmem:[%s3342_s7 + $0x350] sm:$0xff] }
  0x82   : > { %2976 = vmatmul.mubr.msk.f32.gmra.mxu0 %vm1017_vm4, %v955_v13  ;;  %3033 = vmatmul.mubr.msk.f32.gmra.mxu1 %vm1017_vm4, %v993_v53  ;;  %v452_v13 = vadd.s32 %v3325_v3, %v341_v6  ;;  %v462_v53 = vadd.s32 %v3325_v3, %v351_v46  ;;  %vm571_vm1 = vcmp.lt.s32.totalorder %v461_v50, 1749  ;;  %v685_v6 = vld [vmem:[%s3342_s7 + $0x368] sm:$0xff] }
  0x83   : > { %2978 = vmatprep.mubr.msk.f32.mxu0 %vm1017_vm4, %v956_v14  ;;  %3035 = vmatprep.mubr.msk.f32.mxu1 %vm1017_vm4, %v994_v54  ;;  %vm560_vm6 = vcmp.lt.s32.totalorder %v450_v5, 1749  ;;  %v343_v14 = vadd.s32 784, %v3323_v2  ;;  %v353_v54 = vadd.s32 864, %v3323_v2  ;;  %v1013_v2 = vsel %vm573_vm3, %v683_v0, 0.0 }
  0x84   : > { %v1000_v16 = vsel %vm560_vm6, %v670_v12, 0.0  ;;  %vm562_vm8 = vcmp.lt.s32.totalorder %v452_v13, 1749  ;;  %vm572_vm2 = vcmp.lt.s32.totalorder %v462_v53, 1749  ;;  %vm575_vm6 = vcmp.lt.s32.totalorder %v465_v1, 1749 }
  0x85   : > { %v454_v21 = vadd.s32 %v3325_v3, %v343_v14  ;;  %v1002_v24 = vsel %vm562_vm8, %v672_v20, 0.0  ;;  %v1012_v63 = vsel %vm572_vm2, %v682_v60, 0.0 }
  0x86   : > { %2979 = vmatmul.mubr.msk.f32.gmra.mxu0 %vm1017_vm4, %v957_v28  ;;  %3036 = vmatmul.mubr.msk.f32.gmra.mxu1 %vm1017_vm4, %v995_v61  ;;  %v674_v28 = vld [vmem:[%s3342_s7 + $0x310] sm:$0xff]  ;;  %v464_v61 = vadd.s32 %v3325_v3, %v353_v54 }
  0x87   : > { %2981 = vmatprep.mubr.msk.f32.mxu0 %vm1017_vm4, %v958_v29  ;;  %3038 = vmatprep.mubr.msk.f32.mxu1 %vm1017_vm4, %v996_v62  ;;  %vm564_vm10 = vcmp.lt.s32.totalorder %v454_v21, 1749  ;;  %v456_v29 = vadd.s32 %v3325_v3, %v345_v22  ;;  %v1011_v62 = vsel %vm571_vm1, %v681_v57, 0.0 }
  0x88   : > { %v1004_v32 = vsel %vm564_vm10, %v674_v28, 0.0  ;;  %vm574_vm5 = vcmp.lt.s32.totalorder %v464_v61, 1749 }
  0x89   : > { %vm566_vm12 = vcmp.lt.s32.totalorder %v456_v29, 1749  ;;  %v1014_v5 = vsel %vm574_vm5, %v684_v4, 0.0 }
  0x8a   : > { %2982 = vmatmul.mubr.msk.f32.gmra.mxu0 %vm1017_vm4, %v959_v41  ;;  %3039 = vmatmul.mubr.msk.f32.gmra.mxu1 %vm1017_vm4, %v997_v7  ;;  %v1006_v40 = vsel %vm566_vm12, %v676_v36, 0.0  ;;  %v677_v41 = vld [vmem:[%s3342_s7 + $0x328] sm:$0xff]  ;;  %v1015_v7 = vsel %vm575_vm6, %v685_v6, 0.0 }
  0x8b   : > { %2984 = vmatprep.mubr.msk.f32.mxu0 %vm1017_vm4, %v960_v42  ;;  %3041 = vmatprep.mubr.msk.f32.mxu1 %vm1017_vm4, %v998_v8  ;;  %v459_v42 = vadd.s32 %v3325_v3, %v348_v35  ;;  %v1007_v47 = vsel %vm567_vm13, %v677_v41, 0.0 }
  0x8d   : > { %vm569_vm15 = vcmp.lt.s32.totalorder %v459_v42, 1749 }
  0x8e   : > { %2985 = vmatmul.mubr.msk.f32.gmra.mxu0 %vm1017_vm4, %v961_v52  ;;  %3042 = vmatmul.mubr.msk.f32.gmra.mxu1 %vm1017_vm4, %v999_v15  ;;  %v680_v52 = vld [vmem:[%s3342_s7 + $0x340] sm:$0xff]  ;;  %v1009_v55 = vsel %vm569_vm15, %v679_v49, 0.0  ;;  %s3137_s7 = scalar_lea.vmem %s3136_s6, 256 }
  0x8f   : > { %3044 = vmatprep.mubr.msk.f32.mxu1 %vm1017_vm4, %v1000_v16  ;;  %v1010_v56 = vsel %vm570_vm0, %v680_v52, 0.0  ;;  %p3139_p3 = scmp.lt.s32.totalorder %s3137_s7, %s3131_s4 }
  0x91   : > { %p3140_p5 = por %p3139_p3, %p3138_p2 }
  0x92   : > { %3045 = vmatmul.mubr.msk.f32.gmra.mxu1 %vm1017_vm4, %v1001_v23 }
  0x93   : > { %3047 = vmatprep.mubr.msk.f32.mxu1 %vm1017_vm4, %v1002_v24  ;;  %p3141_p6 = pnand %p3140_p5, %p3134_p1 }
  0x96   : > { %3048 = vmatmul.mubr.msk.f32.gmra.mxu1 %vm1017_vm4, %v1003_v31 }
  0x97   : > { %3050 = vmatprep.mubr.msk.f32.mxu1 %vm1017_vm4, %v1004_v32 }
  0x9a   : > { %3051 = vmatmul.mubr.msk.f32.gmra.mxu1 %vm1017_vm4, %v1005_v39 }
  0x9b   : > { %3053 = vmatprep.mubr.msk.f32.mxu1 %vm1017_vm4, %v1006_v40 }
  0x9e   : > { %3054 = vmatmul.mubr.msk.f32.gmra.mxu1 %vm1017_vm4, %v1007_v47 }
  0x9f   : > { %3056 = vmatprep.mubr.msk.f32.mxu1 %vm1017_vm4, %v1008_v48 }
  0xa2   : > { %3057 = vmatmul.mubr.msk.f32.gmra.mxu1 %vm1017_vm4, %v1009_v55 }
  0xa3   : > { %3059 = vmatprep.mubr.msk.f32.mxu1 %vm1017_vm4, %v1010_v56 }
  0xa6   : > { %3060 = vmatmul.mubr.msk.f32.gmra.mxu1 %vm1017_vm4, %v1011_v62 }
  0xa7   : > { %3062 = vmatprep.mubr.msk.f32.mxu1 %vm1017_vm4, %v1012_v63 }
  0xaa   : > { %3063 = vmatmul.mubr.msk.f32.gmra.mxu1 %vm1017_vm4, %v1013_v2 }
  0xab   : > { %3065 = vmatprep.mubr.msk.f32.mxu1 %vm1017_vm4, %v1014_v5 }
  0xae   : > { %3066 = vmatmul.mubr.msk.f32.gmra.mxu1 %vm1017_vm4, %v1015_v7 }
  0xe2   : > { %v2905_v8 = vpop.f32.mrf.mxu0 }
  0xe3   : > { %v2198_v9 = vmul.f32 %v2905_v8, %v2905_v8  ;;  %v1970_v13 = vsel %vm239_vm7, %v2905_v8, 0.0 }
  0xe4   : > { %v1418_v3 = vpop.f32.mrf.mxu0 }
  0xe5   : > { %v1969_v10 = vsel %vm239_vm7, %v1418_v3, 0.0  ;;  %v2197_v11 = vmul.f32 %v1418_v3, %v1418_v3  ;;  %v2308_v17 = vsel %vm239_vm7, %v2198_v9, 0.0 }
  0xe6   : > { %v2908_v12 = vpop.f32.mrf.mxu0  ;;  %v1971_v15 = vadd.f32 %v1970_v13, %v1969_v10 }
  0xe7   : > { %v2307_v14 = vsel %vm239_vm7, %v2197_v11, 0.0  ;;  %v2200_v18 = vmul.f32 %v2908_v12, %v2908_v12  ;;  %v1974_v24 = vsel %vm239_vm7, %v2908_v12, 0.0 }
  0xe8   : > { %v1428_v16 = vpop.f32.mrf.mxu0  ;;  %v2309_v21 = vadd.f32 %v2308_v17, %v2307_v14 }
  0xe9   : > { %v1972_v19 = vsel %vm239_vm7, %v1428_v16, 0.0  ;;  %v2199_v20 = vmul.f32 %v1428_v16, %v1428_v16  ;;  %v2312_v29 = vsel %vm239_vm7, %v2200_v18, 0.0 }
  0xea   : > { %v1973_v22 = vadd.f32 %v1972_v19, %v1971_v15  ;;  %v2911_v23 = vpop.f32.mrf.mxu0 }
  0xeb   : > { %v2310_v25 = vsel %vm239_vm7, %v2199_v20, 0.0  ;;  %v2202_v30 = vmul.f32 %v2911_v23, %v2911_v23  ;;  %v1978_v36 = vsel %vm239_vm7, %v2911_v23, 0.0 }
  0xec   : > { %v2311_v26 = vadd.f32 %v2310_v25, %v2309_v21  ;;  %v1438_v27 = vpop.f32.mrf.mxu0  ;;  %v1975_v28 = vadd.f32 %v1974_v24, %v1973_v22 }
  0xed   : > { %v1976_v31 = vsel %vm239_vm7, %v1438_v27, 0.0  ;;  %v2201_v32 = vmul.f32 %v1438_v27, %v1438_v27  ;;  %v2316_v41 = vsel %vm239_vm7, %v2202_v30, 0.0 }
  0xee   : > { %v1977_v33 = vadd.f32 %v1976_v31, %v1975_v28  ;;  %v2313_v34 = vadd.f32 %v2312_v29, %v2311_v26  ;;  %v2914_v35 = vpop.f32.mrf.mxu0 }
  0xef   : > { %v2314_v37 = vsel %vm239_vm7, %v2201_v32, 0.0  ;;  %v2204_v42 = vmul.f32 %v2914_v35, %v2914_v35  ;;  %v1982_v48 = vsel %vm239_vm7, %v2914_v35, 0.0 }
  0xf0   : > { %v2315_v38 = vadd.f32 %v2314_v37, %v2313_v34  ;;  %v1448_v39 = vpop.f32.mrf.mxu0  ;;  %v1979_v40 = vadd.f32 %v1978_v36, %v1977_v33 }
  0xf1   : > { %v1980_v43 = vsel %vm239_vm7, %v1448_v39, 0.0  ;;  %v2203_v44 = vmul.f32 %v1448_v39, %v1448_v39  ;;  %v2320_v53 = vsel %vm239_vm7, %v2204_v42, 0.0 }
  0xf2   : > { %v1981_v45 = vadd.f32 %v1980_v43, %v1979_v40  ;;  %v2317_v46 = vadd.f32 %v2316_v41, %v2315_v38  ;;  %v2917_v47 = vpop.f32.mrf.mxu0 }
  0xf3   : > { %v2318_v49 = vsel %vm239_vm7, %v2203_v44, 0.0  ;;  %v2206_v54 = vmul.f32 %v2917_v47, %v2917_v47  ;;  %v1986_v60 = vsel %vm239_vm7, %v2917_v47, 0.0 }
  0xf4   : > { %v2319_v50 = vadd.f32 %v2318_v49, %v2317_v46  ;;  %v1458_v51 = vpop.f32.mrf.mxu0  ;;  %v1983_v52 = vadd.f32 %v1982_v48, %v1981_v45 }
  0xf5   : > { %v1984_v55 = vsel %vm239_vm7, %v1458_v51, 0.0  ;;  %v2205_v56 = vmul.f32 %v1458_v51, %v1458_v51  ;;  %v2324_v1 = vsel %vm239_vm7, %v2206_v54, 0.0 }
  0xf6   : > { %v1985_v57 = vadd.f32 %v1984_v55, %v1983_v52  ;;  %v2321_v58 = vadd.f32 %v2320_v53, %v2319_v50  ;;  %v2920_v59 = vpop.f32.mrf.mxu0 }
  0xf7   : > { %v2322_v61 = vsel %vm239_vm7, %v2205_v56, 0.0  ;;  %v2208_v4 = vmul.f32 %v2920_v59, %v2920_v59  ;;  %v1990_v3 = vsel %vm239_vm7, %v2920_v59, 0.0 }
  0xf8   : > { %v2323_v62 = vadd.f32 %v2322_v61, %v2321_v58  ;;  %v1468_v63 = vpop.f32.mrf.mxu0  ;;  %v1987_v0 = vadd.f32 %v1986_v60, %v1985_v57 }
  0xf9   : > { %v1988_v2 = vsel %vm239_vm7, %v1468_v63, 0.0  ;;  %v2207_v5 = vmul.f32 %v1468_v63, %v1468_v63  ;;  %v2328_v13 = vsel %vm239_vm7, %v2208_v4, 0.0 }
  0xfa   : > { %v1989_v6 = vadd.f32 %v1988_v2, %v1987_v0  ;;  %v2325_v7 = vadd.f32 %v2324_v1, %v2323_v62  ;;  %v2923_v8 = vpop.f32.mrf.mxu0 }
  0xfb   : > { %v2326_v9 = vsel %vm239_vm7, %v2207_v5, 0.0  ;;  %v2210_v14 = vmul.f32 %v2923_v8, %v2923_v8  ;;  %v1994_v20 = vsel %vm239_vm7, %v2923_v8, 0.0 }
  0xfc   : > { %v2327_v10 = vadd.f32 %v2326_v9, %v2325_v7  ;;  %v1478_v11 = vpop.f32.mrf.mxu0  ;;  %v1991_v12 = vadd.f32 %v1990_v3, %v1989_v6 }
  0xfd   : > { %v1992_v15 = vsel %vm239_vm7, %v1478_v11, 0.0  ;;  %v2209_v16 = vmul.f32 %v1478_v11, %v1478_v11  ;;  %v2332_v25 = vsel %vm239_vm7, %v2210_v14, 0.0 }
  0xfe   : > { %v1993_v17 = vadd.f32 %v1992_v15, %v1991_v12  ;;  %v2329_v18 = vadd.f32 %v2328_v13, %v2327_v10  ;;  %v2926_v19 = vpop.f32.mrf.mxu0 }
  0xff   : > { %v2330_v21 = vsel %vm239_vm7, %v2209_v16, 0.0  ;;  %v2212_v26 = vmul.f32 %v2926_v19, %v2926_v19  ;;  %v1998_v32 = vsel %vm239_vm7, %v2926_v19, 0.0  ;;  %v3882_v16 = vpop.f32.mrf.mxu1 }
 0x100   : > { %v2331_v22 = vadd.f32 %v2330_v21, %v2329_v18  ;;  %v1488_v23 = vpop.f32.mrf.mxu0  ;;  %v1995_v24 = vadd.f32 %v1994_v20, %v1993_v17 }
 0x101   : > { %v1996_v27 = vsel %vm239_vm7, %v1488_v23, 0.0  ;;  %v2211_v28 = vmul.f32 %v1488_v23, %v1488_v23  ;;  %v2336_v37 = vsel %vm239_vm7, %v2212_v26, 0.0 }
 0x102   : > { %v1997_v29 = vadd.f32 %v1996_v27, %v1995_v24  ;;  %v2333_v30 = vadd.f32 %v2332_v25, %v2331_v22  ;;  %v2929_v31 = vpop.f32.mrf.mxu0  ;;  %v3886_v22 = vpop.f32.mrf.mxu1 }
 0x103   : > { %v2334_v33 = vsel %vm239_vm7, %v2211_v28, 0.0  ;;  %v2214_v38 = vmul.f32 %v2929_v31, %v2929_v31  ;;  %v2002_v44 = vsel %vm239_vm7, %v2929_v31, 0.0 }
 0x104   : > { %v2335_v34 = vadd.f32 %v2334_v33, %v2333_v30  ;;  %v1498_v35 = vpop.f32.mrf.mxu0  ;;  %v1999_v36 = vadd.f32 %v1998_v32, %v1997_v29 }
 0x105   : > { %v2000_v39 = vsel %vm239_vm7, %v1498_v35, 0.0  ;;  %v2213_v40 = vmul.f32 %v1498_v35, %v1498_v35  ;;  %v2340_v49 = vsel %vm239_vm7, %v2214_v38, 0.0 }
 0x106   : > { %v2001_v41 = vadd.f32 %v2000_v39, %v1999_v36  ;;  %v2337_v42 = vadd.f32 %v2336_v37, %v2335_v34  ;;  %v2932_v43 = vpop.f32.mrf.mxu0 }
 0x107   : > { %v2338_v45 = vsel %vm239_vm7, %v2213_v40, 0.0  ;;  %v2216_v50 = vmul.f32 %v2932_v43, %v2932_v43  ;;  %v2006_v56 = vsel %vm239_vm7, %v2932_v43, 0.0  ;;  %v3890_v30 = vpop.f32.mrf.mxu1 }
 0x108   : > { %v2339_v46 = vadd.f32 %v2338_v45, %v2337_v42  ;;  %v1508_v47 = vpop.f32.mrf.mxu0  ;;  %v2003_v48 = vadd.f32 %v2002_v44, %v2001_v41 }
 0x109   : > { %v2004_v51 = vsel %vm239_vm7, %v1508_v47, 0.0  ;;  %v2215_v52 = vmul.f32 %v1508_v47, %v1508_v47  ;;  %v2344_v61 = vsel %vm239_vm7, %v2216_v50, 0.0  ;;  %v3894_v36 = vpop.f32.mrf.mxu1 }
 0x10a   : > { %v2005_v53 = vadd.f32 %v2004_v51, %v2003_v48  ;;  %v2341_v54 = vadd.f32 %v2340_v49, %v2339_v46  ;;  %v2935_v55 = vpop.f32.mrf.mxu0 }
 0x10b   : > { %v2342_v57 = vsel %vm239_vm7, %v2215_v52, 0.0  ;;  %v2218_v62 = vmul.f32 %v2935_v55, %v2935_v55  ;;  %v2010_v5 = vsel %vm239_vm7, %v2935_v55, 0.0  ;;  %v3898_v44 = vpop.f32.mrf.mxu1 }
 0x10c   : > { %v2343_v58 = vadd.f32 %v2342_v57, %v2341_v54  ;;  %v1518_v59 = vpop.f32.mrf.mxu0  ;;  %v2007_v60 = vadd.f32 %v2006_v56, %v2005_v53 }
 0x10d   : > { %v2008_v63 = vsel %vm239_vm7, %v1518_v59, 0.0  ;;  %v2217_v0 = vmul.f32 %v1518_v59, %v1518_v59  ;;  %v2348_v9 = vsel %vm239_vm7, %v2218_v62, 0.0  ;;  %v3902_v50 = vpop.f32.mrf.mxu1 }
 0x10e   : > { %v2009_v1 = vadd.f32 %v2008_v63, %v2007_v60  ;;  %v2345_v4 = vadd.f32 %v2344_v61, %v2343_v58  ;;  %v2938_v2 = vpop.f32.mrf.mxu0 }
 0x10f   : > { %v2346_v6 = vsel %vm239_vm7, %v2217_v0, 0.0  ;;  %v2220_v10 = vmul.f32 %v2938_v2, %v2938_v2  ;;  %v2014_v17 = vsel %vm239_vm7, %v2938_v2, 0.0  ;;  %v3906_v58 = vpop.f32.mrf.mxu1 }
 0x110   : > { %v2347_v7 = vadd.f32 %v2346_v6, %v2345_v4  ;;  %v1528_v8 = vpop.f32.mrf.mxu0  ;;  %v2011_v3 = vadd.f32 %v2010_v5, %v2009_v1 }
 0x111   : > { %v2012_v11 = vsel %vm239_vm7, %v1528_v8, 0.0  ;;  %v2219_v12 = vmul.f32 %v1528_v8, %v1528_v8  ;;  %v2352_v23 = vsel %vm239_vm7, %v2220_v10, 0.0  ;;  %v3910_v0 = vpop.f32.mrf.mxu1 }
 0x112   : > { %v2013_v13 = vadd.f32 %v2012_v11, %v2011_v3  ;;  %v2349_v14 = vadd.f32 %v2348_v9, %v2347_v7  ;;  %v2941_v15 = vpop.f32.mrf.mxu0 }
 0x113   : > { %v2350_v18 = vsel %vm239_vm7, %v2219_v12, 0.0  ;;  %v2222_v24 = vmul.f32 %v2941_v15, %v2941_v15  ;;  %v2018_v31 = vsel %vm239_vm7, %v2941_v15, 0.0  ;;  %v3914_v3 = vpop.f32.mrf.mxu1 }
 0x114   : > { %v2351_v19 = vadd.f32 %v2350_v18, %v2349_v14  ;;  %v1538_v20 = vpop.f32.mrf.mxu0  ;;  %v2015_v21 = vadd.f32 %v2014_v17, %v2013_v13 }
 0x115   : > { %v2016_v25 = vsel %vm239_vm7, %v1538_v20, 0.0  ;;  %v2221_v26 = vmul.f32 %v1538_v20, %v1538_v20  ;;  %v2356_v37 = vsel %vm239_vm7, %v2222_v24, 0.0  ;;  %v3918_v14 = vpop.f32.mrf.mxu1 }
 0x116   : > { %v2017_v27 = vadd.f32 %v2016_v25, %v2015_v21  ;;  %v2353_v28 = vadd.f32 %v2352_v23, %v2351_v19  ;;  %v2944_v29 = vpop.f32.mrf.mxu0 }
 0x117   : > { %v2354_v32 = vsel %vm239_vm7, %v2221_v26, 0.0  ;;  %v2224_v38 = vmul.f32 %v2944_v29, %v2944_v29  ;;  %v2022_v45 = vsel %vm239_vm7, %v2944_v29, 0.0 }
 0x118   : > { %v2355_v33 = vadd.f32 %v2354_v32, %v2353_v28  ;;  %v1548_v34 = vpop.f32.mrf.mxu0  ;;  %v2019_v35 = vadd.f32 %v2018_v31, %v2017_v27 }
 0x119   : > { %v2020_v39 = vsel %vm239_vm7, %v1548_v34, 0.0  ;;  %v2223_v40 = vmul.f32 %v1548_v34, %v1548_v34  ;;  %v2360_v51 = vsel %vm239_vm7, %v2224_v38, 0.0 }
 0x11a   : > { %v2021_v41 = vadd.f32 %v2020_v39, %v2019_v35  ;;  %v2357_v42 = vadd.f32 %v2356_v37, %v2355_v33  ;;  %v2947_v43 = vpop.f32.mrf.mxu0  ;;  %v3922_v24 = vpop.f32.mrf.mxu1 }
 0x11b   : > { %v2358_v46 = vsel %vm239_vm7, %v2223_v40, 0.0  ;;  %v2226_v52 = vmul.f32 %v2947_v43, %v2947_v43  ;;  %v2026_v59 = vsel %vm239_vm7, %v2947_v43, 0.0 }
 0x11c   : > { %v2359_v47 = vadd.f32 %v2358_v46, %v2357_v42  ;;  %v1558_v48 = vpop.f32.mrf.mxu0  ;;  %v2023_v49 = vadd.f32 %v2022_v45, %v2021_v41  ;;  %v3926_v31 = vpop.f32.mrf.mxu1 }
 0x11d   : > { %v2024_v53 = vsel %vm239_vm7, %v1558_v48, 0.0  ;;  %v2225_v54 = vmul.f32 %v1558_v48, %v1558_v48  ;;  %v2364_v1 = vsel %vm239_vm7, %v2226_v52, 0.0 }
 0x11e   : > { %v2025_v55 = vadd.f32 %v2024_v53, %v2023_v49  ;;  %v2361_v56 = vadd.f32 %v2360_v51, %v2359_v47  ;;  %v2950_v57 = vpop.f32.mrf.mxu0  ;;  %v3930_v40 = vpop.f32.mrf.mxu1 }
 0x11f   : > { %v2362_v60 = vsel %vm239_vm7, %v2225_v54, 0.0  ;;  %v2228_v4 = vmul.f32 %v2950_v57, %v2950_v57  ;;  %v2030_v9 = vsel %vm239_vm7, %v2950_v57, 0.0 }
 0x120   : > { %v2363_v61 = vadd.f32 %v2362_v60, %v2361_v56  ;;  %v1568_v62 = vpop.f32.mrf.mxu0  ;;  %v2027_v63 = vadd.f32 %v2026_v59, %v2025_v55  ;;  %v3934_v47 = vpop.f32.mrf.mxu1 }
 0x121   : > { %v2028_v2 = vsel %vm239_vm7, %v1568_v62, 0.0  ;;  %v2227_v5 = vmul.f32 %v1568_v62, %v1568_v62  ;;  %v2368_v15 = vsel %vm239_vm7, %v2228_v4, 0.0 }
 0x122   : > { %v2029_v6 = vadd.f32 %v2028_v2, %v2027_v63  ;;  %v2365_v7 = vadd.f32 %v2364_v1, %v2363_v61  ;;  %v2953_v8 = vpop.f32.mrf.mxu0  ;;  %v3938_v56 = vpop.f32.mrf.mxu1 }
 0x123   : > { %v2366_v10 = vsel %vm239_vm7, %v2227_v5, 0.0  ;;  %v2230_v17 = vmul.f32 %v2953_v8, %v2953_v8  ;;  %v2034_v25 = vsel %vm239_vm7, %v2953_v8, 0.0 }
 0x124   : > { %v2367_v11 = vadd.f32 %v2366_v10, %v2365_v7  ;;  %v1578_v12 = vpop.f32.mrf.mxu0  ;;  %v2031_v13 = vadd.f32 %v2030_v9, %v2029_v6  ;;  %v3942_v63 = vpop.f32.mrf.mxu1 }
 0x125   : > { %v2032_v18 = vsel %vm239_vm7, %v1578_v12, 0.0  ;;  %v2229_v19 = vmul.f32 %v1578_v12, %v1578_v12  ;;  %v2372_v32 = vsel %vm239_vm7, %v2230_v17, 0.0 }
 0x126   : > { %v2033_v20 = vadd.f32 %v2032_v18, %v2031_v13  ;;  %v2369_v21 = vadd.f32 %v2368_v15, %v2367_v11  ;;  %v2956_v23 = vpop.f32.mrf.mxu0  ;;  %v3946_v9 = vpop.f32.mrf.mxu1 }
 0x127   : > { %v2370_v26 = vsel %vm239_vm7, %v2229_v19, 0.0  ;;  %v2232_v33 = vmul.f32 %v2956_v23, %v2956_v23  ;;  %v2038_v41 = vsel %vm239_vm7, %v2956_v23, 0.0 }
 0x128   : > { %v2371_v27 = vadd.f32 %v2370_v26, %v2369_v21  ;;  %v1588_v28 = vpop.f32.mrf.mxu0  ;;  %v2035_v29 = vadd.f32 %v2034_v25, %v2033_v20  ;;  %v3950_v17 = vpop.f32.mrf.mxu1 }
 0x129   : > { %v2036_v34 = vsel %vm239_vm7, %v1588_v28, 0.0  ;;  %v2231_v35 = vmul.f32 %v1588_v28, %v1588_v28  ;;  %v2376_v48 = vsel %vm239_vm7, %v2232_v33, 0.0 }
 0x12a   : > { %v2037_v37 = vadd.f32 %v2036_v34, %v2035_v29  ;;  %v2373_v38 = vadd.f32 %v2372_v32, %v2371_v27  ;;  %v2959_v39 = vpop.f32.mrf.mxu0  ;;  %v3954_v27 = vpop.f32.mrf.mxu1 }
 0x12b   : > { %v2374_v42 = vsel %vm239_vm7, %v2231_v35, 0.0  ;;  %v2234_v49 = vmul.f32 %v2959_v39, %v2959_v39  ;;  %v2042_v57 = vsel %vm239_vm7, %v2959_v39, 0.0 }
 0x12c   : > { %v2375_v43 = vadd.f32 %v2374_v42, %v2373_v38  ;;  %v1598_v45 = vpop.f32.mrf.mxu0  ;;  %v2039_v46 = vadd.f32 %v2038_v41, %v2037_v37  ;;  %v3958_v35 = vpop.f32.mrf.mxu1 }
 0x12d   : > { %v2040_v51 = vsel %vm239_vm7, %v1598_v45, 0.0  ;;  %v2233_v52 = vmul.f32 %v1598_v45, %v1598_v45  ;;  %v2380_v1 = vsel %vm239_vm7, %v2234_v49, 0.0 }
 0x12e   : > { %v2041_v53 = vadd.f32 %v2040_v51, %v2039_v46  ;;  %v2377_v54 = vadd.f32 %v2376_v48, %v2375_v43  ;;  %v2962_v55 = vpop.f32.mrf.mxu0  ;;  %v3962_v46 = vpop.f32.mrf.mxu1 }
 0x12f   : > { %v2378_v59 = vsel %vm239_vm7, %v2233_v52, 0.0  ;;  %v2236_v4 = vmul.f32 %v2962_v55, %v2962_v55  ;;  %v2046_v10 = vsel %vm239_vm7, %v2962_v55, 0.0 }
 0x130   : > { %v2379_v60 = vadd.f32 %v2378_v59, %v2377_v54  ;;  %v1608_v61 = vpop.f32.mrf.mxu0  ;;  %v2043_v62 = vadd.f32 %v2042_v57, %v2041_v53  ;;  %v3966_v54 = vpop.f32.mrf.mxu1 }
 0x131   : > { %v2044_v2 = vsel %vm239_vm7, %v1608_v61, 0.0  ;;  %v2235_v5 = vmul.f32 %v1608_v61, %v1608_v61  ;;  %v2384_v18 = vsel %vm239_vm7, %v2236_v4, 0.0 }
 0x132   : > { %v2045_v6 = vadd.f32 %v2044_v2, %v2043_v62  ;;  %v2381_v7 = vadd.f32 %v2380_v1, %v2379_v60  ;;  %v2965_v8 = vpop.f32.mrf.mxu0  ;;  %v3970_v4 = vpop.f32.mrf.mxu1 }
 0x133   : > { %v2382_v11 = vsel %vm239_vm7, %v2235_v5, 0.0  ;;  %v2238_v19 = vmul.f32 %v2965_v8, %v2965_v8  ;;  %v2050_v28 = vsel %vm239_vm7, %v2965_v8, 0.0 }
 0x134   : > { %v2383_v12 = vadd.f32 %v2382_v11, %v2381_v7  ;;  %v1618_v13 = vpop.f32.mrf.mxu0  ;;  %v2047_v15 = vadd.f32 %v2046_v10, %v2045_v6  ;;  %v3974_v10 = vpop.f32.mrf.mxu1 }
 0x135   : > { %v2048_v20 = vsel %vm239_vm7, %v1618_v13, 0.0  ;;  %v2237_v21 = vmul.f32 %v1618_v13, %v1618_v13  ;;  %v2388_v37 = vsel %vm239_vm7, %v2238_v19, 0.0 }
 0x136   : > { %v2049_v23 = vadd.f32 %v2048_v20, %v2047_v15  ;;  %v2385_v25 = vadd.f32 %v2384_v18, %v2383_v12  ;;  %v2968_v26 = vpop.f32.mrf.mxu0 }
 0x137   : > { %v2386_v29 = vsel %vm239_vm7, %v2237_v21, 0.0  ;;  %v2240_v38 = vmul.f32 %v2968_v26, %v2968_v26  ;;  %v2054_v48 = vsel %vm239_vm7, %v2968_v26, 0.0 }
 0x138   : > { %v2387_v32 = vadd.f32 %v2386_v29, %v2385_v25  ;;  %v1628_v33 = vpop.f32.mrf.mxu0  ;;  %v2051_v34 = vadd.f32 %v2050_v28, %v2049_v23  ;;  %v3980_v29 = vpop.f32.mrf.mxu1 }
 0x139   : > { %v2052_v39 = vsel %vm239_vm7, %v1628_v33, 0.0  ;;  %v2239_v41 = vmul.f32 %v1628_v33, %v1628_v33  ;;  %v2392_v55 = vsel %vm239_vm7, %v2240_v38, 0.0 }
 0x13a   : > { %v2053_v42 = vadd.f32 %v2052_v39, %v2051_v34  ;;  %v2389_v43 = vadd.f32 %v2388_v37, %v2387_v32  ;;  %v2971_v45 = vpop.f32.mrf.mxu0 }
 0x13b   : > { %v2390_v49 = vsel %vm239_vm7, %v2239_v41, 0.0  ;;  %v2242_v57 = vmul.f32 %v2971_v45, %v2971_v45  ;;  %v2058_v2 = vsel %vm239_vm7, %v2971_v45, 0.0 }
 0x13c   : > { %v2391_v51 = vadd.f32 %v2390_v49, %v2389_v43  ;;  %v1638_v52 = vpop.f32.mrf.mxu0  ;;  %v2055_v53 = vadd.f32 %v2054_v48, %v2053_v42 }
 0x13d   : > { %v2056_v59 = vsel %vm239_vm7, %v1638_v52, 0.0  ;;  %v2241_v60 = vmul.f32 %v1638_v52, %v1638_v52  ;;  %v2396_v11 = vsel %vm239_vm7, %v2242_v57, 0.0 }
 0x13e   : > { %v2057_v61 = vadd.f32 %v2056_v59, %v2055_v53  ;;  %v2393_v62 = vadd.f32 %v2392_v55, %v2391_v51  ;;  %v2974_v1 = vpop.f32.mrf.mxu0  ;;  %v3986_v51 = vpop.f32.mrf.mxu1 }
 0x13f   : > { %v2394_v5 = vsel %vm239_vm7, %v2241_v60, 0.0  ;;  %v2244_v12 = vmul.f32 %v2974_v1, %v2974_v1  ;;  %v2062_v21 = vsel %vm239_vm7, %v2974_v1, 0.0 }
 0x140   : > { %v2395_v6 = vadd.f32 %v2394_v5, %v2393_v62  ;;  %v1648_v7 = vpop.f32.mrf.mxu0  ;;  %v2059_v8 = vadd.f32 %v2058_v2, %v2057_v61 }
 0x141   : > { %v2060_v13 = vsel %vm239_vm7, %v1648_v7, 0.0  ;;  %v2243_v15 = vmul.f32 %v1648_v7, %v1648_v7  ;;  %v2400_v32 = vsel %vm239_vm7, %v2244_v12, 0.0  ;;  %v3995_v7 = vpop.f32.mrf.mxu1 }
 0x142   : > { %v2061_v18 = vadd.f32 %v2060_v13, %v2059_v8  ;;  %v2397_v19 = vadd.f32 %v2396_v11, %v2395_v6  ;;  %v2977_v20 = vpop.f32.mrf.mxu0 }
 0x143   : > { %v2398_v23 = vsel %vm239_vm7, %v2243_v15, 0.0  ;;  %v2246_v33 = vmul.f32 %v2977_v20, %v2977_v20  ;;  %v2066_v42 = vsel %vm239_vm7, %v2977_v20, 0.0 }
 0x144   : > { %v2399_v25 = vadd.f32 %v2398_v23, %v2397_v19  ;;  %v1658_v26 = vpop.f32.mrf.mxu0  ;;  %v2063_v28 = vadd.f32 %v2062_v21, %v2061_v18 }
 0x145   : > { %v2064_v34 = vsel %vm239_vm7, %v1658_v26, 0.0  ;;  %v2245_v37 = vmul.f32 %v1658_v26, %v1658_v26  ;;  %v2404_v52 = vsel %vm239_vm7, %v2246_v33, 0.0 }
 0x146   : > { %v2065_v38 = vadd.f32 %v2064_v34, %v2063_v28  ;;  %v2401_v39 = vadd.f32 %v2400_v32, %v2399_v25  ;;  %v2980_v41 = vpop.f32.mrf.mxu0  ;;  %v4002_v28 = vpop.f32.mrf.mxu1 }
 0x147   : > { %v2402_v43 = vsel %vm239_vm7, %v2245_v37, 0.0  ;;  %v2248_v53 = vmul.f32 %v2980_v41, %v2980_v41  ;;  %v2070_v62 = vsel %vm239_vm7, %v2980_v41, 0.0 }
 0x148   : > { %v2403_v45 = vadd.f32 %v2402_v43, %v2401_v39  ;;  %v1668_v48 = vpop.f32.mrf.mxu0  ;;  %v2067_v49 = vadd.f32 %v2066_v42, %v2065_v38  ;;  %v2253_v43 = vmul.f32 %v3886_v22, %v3886_v22 }
 0x149   : > { %v2068_v55 = vsel %vm239_vm7, %v1668_v48, 0.0  ;;  %v2247_v57 = vmul.f32 %v1668_v48, %v1668_v48  ;;  %v2408_v8 = vsel %vm239_vm7, %v2248_v53, 0.0 }
 0x14a   : > { %v2069_v59 = vadd.f32 %v2068_v55, %v2067_v49  ;;  %v2405_v60 = vadd.f32 %v2404_v52, %v2403_v45  ;;  %v2983_v61 = vpop.f32.mrf.mxu0  ;;  %v4010_v49 = vpop.f32.mrf.mxu1  ;;  %v3239_v52 = vmov 0.0   ;;  %v2254_v55 = vmul.f32 %v3882_v16, %v3882_v16 }
 0x14b   : > { %v2406_v1 = vsel %vm239_vm7, %v2247_v57, 0.0  ;;  %v2250_v11 = vmul.f32 %v2983_v61, %v2983_v61  ;;  %v2074_v20 = vsel %vm239_vm7, %v2983_v61, 0.0  ;;  %240 = vst.msk [vmem:[%s4012_s10] sm:$0xff] %vm239_vm7, %v3239_v52  ;;  %241 = vst.msk [vmem:[%s4016_s11] sm:$0xff] %vm239_vm7, %v3239_v52  ;;  %v2080_v57 = vsel %vm239_vm7, %v3886_v22, 0.0 }
 0x14c   : > { %v2407_v2 = vadd.f32 %v2406_v1, %v2405_v60  ;;  %v1678_v5 = vpop.f32.mrf.mxu0  ;;  %v2071_v6 = vadd.f32 %v2070_v62, %v2069_v59  ;;  %v2082_v61 = vsel %vm239_vm7, %v3882_v16, 0.0  ;;  %v2418_v62 = vsel %vm239_vm7, %v2253_v43, 0.0 }
 0x14d   : > { %v2072_v12 = vsel %vm239_vm7, %v1678_v5, 0.0  ;;  %v2249_v13 = vmul.f32 %v1678_v5, %v1678_v5  ;;  %v2412_v32 = vsel %vm239_vm7, %v2250_v11, 0.0  ;;  %v2255_v1 = vmul.f32 %v3894_v36, %v3894_v36 }
 0x14e   : > { %v2073_v15 = vadd.f32 %v2072_v12, %v2071_v6  ;;  %v2409_v18 = vadd.f32 %v2408_v8, %v2407_v2  ;;  %v2986_v19 = vpop.f32.mrf.mxu0  ;;  %v4030_v6 = vpop.f32.mrf.mxu1  ;;  %v2420_v8 = vsel %vm239_vm7, %v2254_v55, 0.0  ;;  %v2256_v11 = vmul.f32 %v3890_v30, %v3890_v30 }
 0x14f   : > { %v2410_v21 = vsel %vm239_vm7, %v2249_v13, 0.0  ;;  %v2252_v33 = vmul.f32 %v2986_v19, %v2986_v19  ;;  %v2078_v41 = vsel %vm239_vm7, %v2986_v19, 0.0  ;;  %v2084_v22 = vsel %vm239_vm7, %v3894_v36, 0.0 }
 0x150   : > { %v2411_v23 = vadd.f32 %v2410_v21, %v2409_v18  ;;  %v1688_v25 = vpop.f32.mrf.mxu0  ;;  %v2075_v26 = vadd.f32 %v2074_v20, %v2073_v15  ;;  %v2086_v16 = vsel %vm239_vm7, %v3890_v30, 0.0  ;;  %v2422_v15 = vsel %vm239_vm7, %v2255_v1, 0.0  ;;  %v4042_v21 = vpop.f32.mrf.mxu1 }
 0x151   : > { %v2076_v34 = vsel %vm239_vm7, %v1688_v25, 0.0  ;;  %v2251_v37 = vmul.f32 %v1688_v25, %v1688_v25  ;;  %v2416_v53 = vsel %vm239_vm7, %v2252_v33, 0.0  ;;  %v2257_v18 = vmul.f32 %v3902_v50, %v3902_v50 }
 0x152   : > { %v2077_v38 = vadd.f32 %v2076_v34, %v2075_v26  ;;  %v2413_v39 = vadd.f32 %v2412_v32, %v2411_v23  ;;  %v2424_v23 = vsel %vm239_vm7, %v2256_v11, 0.0  ;;  %v2258_v25 = vmul.f32 %v3898_v44, %v3898_v44 }
 0x153   : > { %v2414_v42 = vsel %vm239_vm7, %v2251_v37, 0.0  ;;  %v2088_v36 = vsel %vm239_vm7, %v3902_v50, 0.0  ;;  %v2090_v30 = vsel %vm239_vm7, %v3898_v44, 0.0  ;;  %v2426_v33 = vsel %vm239_vm7, %v2257_v18, 0.0 }
 0x154   : > { %v2079_v45 = vadd.f32 %v2078_v41, %v2077_v38  ;;  %v2415_v48 = vadd.f32 %v2414_v42, %v2413_v39  ;;  %v2259_v34 = vmul.f32 %v3910_v0, %v3910_v0  ;;  %v4054_v39 = vpop.f32.mrf.mxu1  ;;  %v2428_v41 = vsel %vm239_vm7, %v2258_v25, 0.0 }
 0x155   : > { %v2260_v42 = vmul.f32 %v3906_v58, %v3906_v58  ;;  %v2092_v50 = vsel %vm239_vm7, %v3910_v0, 0.0  ;;  %v2094_v44 = vsel %vm239_vm7, %v3906_v58, 0.0  ;;  %v2261_v52 = vmul.f32 %v3918_v14, %v3918_v14 }
 0x156   : > { %v2417_v59 = vadd.f32 %v2416_v53, %v2415_v48  ;;  %v2081_v60 = vadd.f32 %v2080_v57, %v2079_v45  ;;  %v2430_v48 = vsel %vm239_vm7, %v2259_v34, 0.0  ;;  %v4066_v57 = vpop.f32.mrf.mxu1  ;;  %v2096_v0 = vsel %vm239_vm7, %v3918_v14, 0.0 }
 0x157   : > { %v2098_v58 = vsel %vm239_vm7, %v3914_v3, 0.0  ;;  %v2434_v1 = vsel %vm239_vm7, %v2261_v52, 0.0  ;;  %v2100_v14 = vsel %vm239_vm7, %v3926_v31, 0.0  ;;  %v2265_v18 = vmul.f32 %v3934_v47, %v3934_v47 }
 0x158   : > { %v2419_v2 = vadd.f32 %v2418_v62, %v2417_v59  ;;  %v2083_v5 = vadd.f32 %v2082_v61, %v2081_v60  ;;  %v2432_v59 = vsel %vm239_vm7, %v2260_v42, 0.0  ;;  %v2262_v60 = vmul.f32 %v3914_v3, %v3914_v3  ;;  %v4078_v11 = vpop.f32.mrf.mxu1 }
 0x159   : > { %v2102_v3 = vsel %vm239_vm7, %v3922_v24, 0.0  ;;  %v2268_v42 = vmul.f32 %v3938_v56, %v3938_v56 }
 0x15a   : > { %v2085_v12 = vadd.f32 %v2084_v22, %v2083_v5  ;;  %v2421_v13 = vadd.f32 %v2420_v8, %v2419_v2  ;;  %v2263_v2 = vmul.f32 %v3926_v31, %v3926_v31  ;;  %v2436_v22 = vsel %vm239_vm7, %v2262_v60, 0.0 }
 0x15b   : > { %v2104_v31 = vsel %vm239_vm7, %v3934_v47, 0.0  ;;  %v2108_v47 = vsel %vm239_vm7, %v3942_v63, 0.0 }
 0x15c   : > { %v2423_v19 = vadd.f32 %v2422_v15, %v2421_v13  ;;  %v2087_v20 = vadd.f32 %v2086_v16, %v2085_v12  ;;  %v2264_v12 = vmul.f32 %v3922_v24, %v3922_v24  ;;  %v2438_v15 = vsel %vm239_vm7, %v2263_v2, 0.0 }
 0x15d   : > { %v2106_v24 = vsel %vm239_vm7, %v3930_v40, 0.0 }
 0x15e   : > { %v2089_v26 = vadd.f32 %v2088_v36, %v2087_v20  ;;  %v2425_v32 = vadd.f32 %v2424_v23, %v2423_v19  ;;  %v4090_v23 = vpop.f32.mrf.mxu1  ;;  %v2440_v25 = vsel %vm239_vm7, %v2264_v12, 0.0  ;;  %v2266_v36 = vmul.f32 %v3930_v40, %v3930_v40 }
 0x15f   : > { %v2110_v40 = vsel %vm239_vm7, %v3938_v56, 0.0  ;;  %v2114_v56 = vsel %vm239_vm7, %v3946_v9, 0.0 }
 0x160   : > { %v2427_v37 = vadd.f32 %v2426_v33, %v2425_v32  ;;  %v2091_v38 = vadd.f32 %v2090_v30, %v2089_v26  ;;  %v2442_v30 = vsel %vm239_vm7, %v2265_v18, 0.0  ;;  %v2267_v33 = vmul.f32 %v3942_v63, %v3942_v63 }
 0x161   : > { %v2112_v63 = vsel %vm239_vm7, %v3950_v17, 0.0 }
 0x162   : > { %v2093_v43 = vadd.f32 %v2092_v50, %v2091_v38  ;;  %v2429_v45 = vadd.f32 %v2428_v41, %v2427_v37  ;;  %v4102_v38 = vpop.f32.mrf.mxu1  ;;  %v2444_v41 = vsel %vm239_vm7, %v2266_v36, 0.0 }
 0x164   : > { %v2431_v53 = vadd.f32 %v2430_v48, %v2429_v45  ;;  %v2095_v55 = vadd.f32 %v2094_v44, %v2093_v43  ;;  %v2446_v45 = vsel %vm239_vm7, %v2267_v33, 0.0  ;;  %v2269_v44 = vmul.f32 %v3950_v17, %v3950_v17 }
 0x165   : > { %v2116_v17 = vsel %vm239_vm7, %v3958_v35, 0.0  ;;  %v2276_v33 = vmul.f32 %v3970_v4, %v3970_v4 }
 0x166   : > { %v2097_v61 = vadd.f32 %v2096_v0, %v2095_v55  ;;  %v2433_v62 = vadd.f32 %v2432_v59, %v2431_v53  ;;  %v4114_v53 = vpop.f32.mrf.mxu1  ;;  %v2448_v55 = vsel %vm239_vm7, %v2268_v42, 0.0  ;;  %v2270_v59 = vmul.f32 %v3946_v9, %v3946_v9 }
 0x167   : > { %v2118_v9 = vsel %vm239_vm7, %v3954_v27, 0.0  ;;  %v2277_v42 = vmul.f32 %v3986_v51, %v3986_v51 }
 0x168   : > { %v2435_v5 = vadd.f32 %v2434_v1, %v2433_v62  ;;  %v2099_v8 = vadd.f32 %v2098_v58, %v2097_v61  ;;  %v2450_v61 = vsel %vm239_vm7, %v2269_v44, 0.0  ;;  %v2271_v62 = vmul.f32 %v3958_v35, %v3958_v35  ;;  %v4126_v2 = vpop.f32.mrf.mxu1 }
 0x169   : > { %v2120_v35 = vsel %vm239_vm7, %v3966_v54, 0.0 }
 0x16a   : > { %v2101_v13 = vadd.f32 %v2100_v14, %v2099_v8  ;;  %v2437_v16 = vadd.f32 %v2436_v22, %v2435_v5  ;;  %v2452_v5 = vsel %vm239_vm7, %v2270_v59, 0.0  ;;  %v2272_v8 = vmul.f32 %v3954_v27, %v3954_v27 }
 0x16b   : > { %v2454_v14 = vsel %vm239_vm7, %v2271_v62, 0.0  ;;  %v2122_v27 = vsel %vm239_vm7, %v3962_v46, 0.0 }
 0x16c   : > { %v2439_v19 = vadd.f32 %v2438_v15, %v2437_v16  ;;  %v2103_v20 = vadd.f32 %v2102_v3, %v2101_v13  ;;  %v2273_v13 = vmul.f32 %v3966_v54, %v3966_v54  ;;  %v4138_v15 = vpop.f32.mrf.mxu1  ;;  %v2456_v18 = vsel %vm239_vm7, %v2272_v8, 0.0 }
 0x16d   : > { %v2124_v54 = vsel %vm239_vm7, %v3974_v10, 0.0 }
 0x16e   : > { %v2105_v26 = vadd.f32 %v2104_v31, %v2103_v20  ;;  %v2441_v32 = vadd.f32 %v2440_v25, %v2439_v19  ;;  %v2274_v19 = vmul.f32 %v3962_v46, %v3962_v46  ;;  %v2458_v36 = vsel %vm239_vm7, %v2273_v13, 0.0 }
 0x16f   : > { %v2275_v31 = vmul.f32 %v3974_v10, %v3974_v10  ;;  %v2126_v46 = vsel %vm239_vm7, %v3970_v4, 0.0  ;;  %v2128_v10 = vsel %vm239_vm7, %v3986_v51, 0.0  ;;  %v2130_v4 = vsel %vm239_vm7, %v3980_v29, 0.0 }
 0x170   : > { %v2443_v34 = vadd.f32 %v2442_v30, %v2441_v32  ;;  %v2107_v37 = vadd.f32 %v2106_v24, %v2105_v26  ;;  %v4150_v24 = vpop.f32.mrf.mxu1  ;;  %v2460_v30 = vsel %vm239_vm7, %v2274_v19, 0.0  ;;  %v2132_v51 = vsel %vm239_vm7, %v4002_v28, 0.0 }
 0x172   : > { %v2109_v50 = vadd.f32 %v2108_v47, %v2107_v37  ;;  %v2445_v43 = vadd.f32 %v2444_v41, %v2443_v34  ;;  %v2462_v41 = vsel %vm239_vm7, %v2275_v31, 0.0  ;;  %v2285_v31 = vmul.f32 %v4078_v11, %v4078_v11 }
 0x174   : > { %v2447_v48 = vadd.f32 %v2446_v45, %v2445_v43  ;;  %v2111_v52 = vadd.f32 %v2110_v40, %v2109_v50  ;;  %v4162_v43 = vpop.f32.mrf.mxu1  ;;  %v2464_v40 = vsel %vm239_vm7, %v2276_v33, 0.0  ;;  %v2278_v45 = vmul.f32 %v3980_v29, %v3980_v29 }
 0x175   : > { %v2134_v29 = vsel %vm239_vm7, %v3995_v7, 0.0 }
 0x176   : > { %v2113_v60 = vadd.f32 %v2112_v63, %v2111_v52  ;;  %v2449_v0 = vadd.f32 %v2448_v55, %v2447_v48  ;;  %v2466_v52 = vsel %vm239_vm7, %v2277_v42, 0.0  ;;  %v2279_v55 = vmul.f32 %v4002_v28, %v4002_v28 }
 0x177   : > { %v2136_v28 = vsel %vm239_vm7, %v4030_v6, 0.0 }
 0x178   : > { %v2451_v58 = vadd.f32 %v2450_v61, %v2449_v0  ;;  %v2115_v1 = vadd.f32 %v2114_v56, %v2113_v60  ;;  %v4174_v60 = vpop.f32.mrf.mxu1  ;;  %v2468_v0 = vsel %vm239_vm7, %v2278_v45, 0.0  ;;  %v2280_v56 = vmul.f32 %v3995_v7, %v3995_v7 }
 0x179   : > { %v2138_v7 = vsel %vm239_vm7, %v4010_v49, 0.0  ;;  %v2288_v45 = vmul.f32 %v4090_v23, %v4090_v23 }
 0x17a   : > { %v2117_v22 = vadd.f32 %v2116_v17, %v2115_v1  ;;  %v2453_v12 = vadd.f32 %v2452_v5, %v2451_v58  ;;  %v2470_v58 = vsel %vm239_vm7, %v2279_v55, 0.0  ;;  %v2281_v1 = vmul.f32 %v4030_v6, %v4030_v6  ;;  %v4186_v17 = vpop.f32.mrf.mxu1 }
 0x17b   : > { %v2140_v6 = vsel %vm239_vm7, %v4054_v39, 0.0 }
 0x17c   : > { %v2455_v16 = vadd.f32 %v2454_v14, %v2453_v12  ;;  %v2119_v3 = vadd.f32 %v2118_v9, %v2117_v22  ;;  %v2472_v22 = vsel %vm239_vm7, %v2280_v56, 0.0  ;;  %v2282_v12 = vmul.f32 %v4010_v49, %v4010_v49  ;;  %v4198_v19 = vpop.f32.mrf.mxu1 }
 0x17d   : > { %v2474_v13 = vsel %vm239_vm7, %v2281_v1, 0.0  ;;  %v2142_v49 = vsel %vm239_vm7, %v4042_v21, 0.0 }
 0x17e   : > { %v2121_v20 = vadd.f32 %v2120_v35, %v2119_v3  ;;  %v2457_v25 = vadd.f32 %v2456_v18, %v2455_v16  ;;  %v2283_v16 = vmul.f32 %v4054_v39, %v4054_v39  ;;  %v2476_v35 = vsel %vm239_vm7, %v2282_v12, 0.0 }
 0x17f   : > { %v2144_v39 = vsel %vm239_vm7, %v4078_v11, 0.0  ;;  %v2148_v11 = vsel %vm239_vm7, %v4102_v38, 0.0 }
 0x180   : > { %v2459_v26 = vadd.f32 %v2458_v36, %v2457_v25  ;;  %v2123_v32 = vadd.f32 %v2122_v27, %v2121_v20  ;;  %v2284_v20 = vmul.f32 %v4042_v21, %v4042_v21  ;;  %v2478_v36 = vsel %vm239_vm7, %v2283_v16, 0.0 }
 0x181   : > { %v2146_v21 = vsel %vm239_vm7, %v4066_v57, 0.0 }
 0x182   : > { %v2125_v34 = vadd.f32 %v2124_v54, %v2123_v32  ;;  %v2461_v37 = vadd.f32 %v2460_v30, %v2459_v26  ;;  %v4210_v30 = vpop.f32.mrf.mxu1  ;;  %v2480_v33 = vsel %vm239_vm7, %v2284_v20, 0.0  ;;  %v2286_v54 = vmul.f32 %v4066_v57, %v4066_v57 }
 0x183   : > { %v2150_v57 = vsel %vm239_vm7, %v4090_v23, 0.0  ;;  %v2154_v23 = vsel %vm239_vm7, %v4114_v53, 0.0 }
 0x184   : > { %v2463_v47 = vadd.f32 %v2462_v41, %v2461_v37  ;;  %v2127_v50 = vadd.f32 %v2126_v46, %v2125_v34  ;;  %v2482_v46 = vsel %vm239_vm7, %v2285_v31, 0.0  ;;  %v2287_v41 = vmul.f32 %v4102_v38, %v4102_v38 }
 0x185   : > { %v2152_v38 = vsel %vm239_vm7, %v4126_v2, 0.0  ;;  %v2296_v31 = vmul.f32 %v4186_v17, %v4186_v17 }
 0x186   : > { %v2129_v44 = vadd.f32 %v2128_v10, %v2127_v50  ;;  %v2465_v48 = vadd.f32 %v2464_v40, %v2463_v47  ;;  %v1918_v50 = vpop.f32.mrf.mxu1  ;;  %v2484_v40 = vsel %vm239_vm7, %v2286_v54, 0.0 }
 0x187   : > { %v2297_v54 = vmul.f32 %v1918_v50, %v1918_v50 }
 0x188   : > { %v2467_v59 = vadd.f32 %v2466_v52, %v2465_v48  ;;  %v2131_v63 = vadd.f32 %v2130_v4, %v2129_v44  ;;  %v2486_v48 = vsel %vm239_vm7, %v2287_v41, 0.0  ;;  %v2289_v4 = vmul.f32 %v4126_v2, %v4126_v2 }
 0x189   : > { %v2156_v2 = vsel %vm239_vm7, %v4150_v24, 0.0  ;;  %v2168_v41 = vsel %vm239_vm7, %v1918_v50, 0.0 }
 0x18a   : > { %v2133_v61 = vadd.f32 %v2132_v51, %v2131_v63  ;;  %v2469_v62 = vadd.f32 %v2468_v0, %v2467_v59  ;;  %v3058_v59 = vpop.f32.mrf.mxu1  ;;  %v2488_v63 = vsel %vm239_vm7, %v2288_v45, 0.0  ;;  %v2290_v0 = vmul.f32 %v4114_v53, %v4114_v53 }
 0x18b   : > { %v2158_v53 = vsel %vm239_vm7, %v4138_v15, 0.0  ;;  %v2174_v50 = vsel %vm239_vm7, %v3058_v59, 0.0 }
 0x18c   : > { %v2471_v5 = vadd.f32 %v2470_v58, %v2469_v62  ;;  %v2135_v8 = vadd.f32 %v2134_v29, %v2133_v61  ;;  %v2490_v61 = vsel %vm239_vm7, %v2289_v4, 0.0  ;;  %v2291_v62 = vmul.f32 %v4150_v24, %v4150_v24  ;;  %v1928_v1 = vpop.f32.mrf.mxu1 }
 0x18d   : > { %v2160_v24 = vsel %vm239_vm7, %v4174_v60, 0.0 }
 0x18e   : > { %v2137_v9 = vadd.f32 %v2136_v28, %v2135_v8  ;;  %v2473_v14 = vadd.f32 %v2472_v22, %v2471_v5  ;;  %v2492_v5 = vsel %vm239_vm7, %v2290_v0, 0.0  ;;  %v2292_v8 = vmul.f32 %v4138_v15, %v4138_v15 }
 0x18f   : > { %v2494_v28 = vsel %vm239_vm7, %v2291_v62, 0.0  ;;  %v2162_v15 = vsel %vm239_vm7, %v4162_v43, 0.0 }
 0x190   : > { %v2475_v3 = vadd.f32 %v2474_v13, %v2473_v14  ;;  %v2139_v18 = vadd.f32 %v2138_v7, %v2137_v9  ;;  %v2293_v9 = vmul.f32 %v4174_v60, %v4174_v60  ;;  %v3061_v13 = vpop.f32.mrf.mxu1  ;;  %v2496_v16 = vsel %vm239_vm7, %v2292_v8, 0.0 }
 0x191   : > { %v2164_v60 = vsel %vm239_vm7, %v4198_v19, 0.0 }
 0x192   : > { %v2141_v25 = vadd.f32 %v2140_v6, %v2139_v18  ;;  %v2477_v27 = vadd.f32 %v2476_v35, %v2475_v3  ;;  %v2294_v3 = vmul.f32 %v4162_v43, %v4162_v43  ;;  %v2498_v20 = vsel %vm239_vm7, %v2293_v9, 0.0 }
 0x193   : > { %v2295_v6 = vmul.f32 %v4198_v19, %v4198_v19  ;;  %v2166_v43 = vsel %vm239_vm7, %v4186_v17, 0.0  ;;  %v2506_v17 = vsel %vm239_vm7, %v2297_v54, 0.0 }
 0x194   : > { %v2479_v26 = vadd.f32 %v2478_v36, %v2477_v27  ;;  %v2143_v32 = vadd.f32 %v2142_v49, %v2141_v25  ;;  %v1938_v49 = vpop.f32.mrf.mxu1  ;;  %v2500_v36 = vsel %vm239_vm7, %v2294_v3, 0.0 }
 0x196   : > { %v2145_v34 = vadd.f32 %v2144_v39, %v2143_v32  ;;  %v2481_v37 = vadd.f32 %v2480_v33, %v2479_v26  ;;  %v2502_v33 = vsel %vm239_vm7, %v2295_v6, 0.0 }
 0x198   : > { %v2483_v42 = vadd.f32 %v2482_v46, %v2481_v37  ;;  %v2147_v47 = vadd.f32 %v2146_v21, %v2145_v34  ;;  %v3064_v37 = vpop.f32.mrf.mxu1  ;;  %v2504_v21 = vsel %vm239_vm7, %v2296_v31, 0.0  ;;  %v2298_v46 = vmul.f32 %v4210_v30, %v4210_v30 }
 0x199   : > { %v2182_v9 = vsel %vm239_vm7, %v3064_v37, 0.0 }
 0x19a   : > { %v2149_v10 = vadd.f32 %v2148_v11, %v2147_v47  ;;  %v2485_v44 = vadd.f32 %v2484_v40, %v2483_v42  ;;  %v2170_v47 = vsel %vm239_vm7, %v4210_v30, 0.0  ;;  %v2299_v40 = vmul.f32 %v1928_v1, %v1928_v1 }
 0x19c   : > { %v2487_v52 = vadd.f32 %v2486_v48, %v2485_v44  ;;  %v2151_v55 = vadd.f32 %v2150_v57, %v2149_v10  ;;  %v1948_v10 = vpop.f32.mrf.mxu1  ;;  %v2508_v44 = vsel %vm239_vm7, %v2298_v46, 0.0  ;;  %v2300_v57 = vmul.f32 %v3058_v59, %v3058_v59 }
 0x19d   : > { %v2172_v48 = vsel %vm239_vm7, %v1928_v1, 0.0  ;;  %v2303_v1 = vmul.f32 %v1948_v10, %v1948_v10 }
 0x19e   : > { %v2153_v56 = vadd.f32 %v2152_v38, %v2151_v55  ;;  %v2489_v51 = vadd.f32 %v2488_v63, %v2487_v52  ;;  %v2510_v55 = vsel %vm239_vm7, %v2299_v40, 0.0  ;;  %v2301_v63 = vmul.f32 %v1938_v49, %v1938_v49  ;;  %v3067_v38 = vpop.f32.mrf.mxu1 }
 0x1a0   : > { %v2491_v29 = vadd.f32 %v2490_v61, %v2489_v51  ;;  %v2155_v58 = vadd.f32 %v2154_v23, %v2153_v56  ;;  %v2512_v56 = vsel %vm239_vm7, %v2300_v57, 0.0  ;;  %v2302_v51 = vmul.f32 %v3061_v13, %v3061_v13  ;;  %v1958_v8 = vpop.f32.mrf.mxu1 }
 0x1a1   : > { %v2176_v23 = vsel %vm239_vm7, %v1938_v49, 0.0 }
 0x1a2   : > { %v2157_v22 = vadd.f32 %v2156_v2, %v2155_v58  ;;  %v2493_v12 = vadd.f32 %v2492_v5, %v2491_v29  ;;  %v2178_v29 = vsel %vm239_vm7, %v3061_v13, 0.0  ;;  %v2514_v58 = vsel %vm239_vm7, %v2301_v63, 0.0 }
 0x1a3   : > { %v2516_v2 = vsel %vm239_vm7, %v2302_v51, 0.0 }
 0x1a4   : > { %v2495_v14 = vadd.f32 %v2494_v28, %v2493_v12  ;;  %v2159_v7 = vadd.f32 %v2158_v53, %v2157_v22  ;;  %v2304_v22 = vmul.f32 %v3064_v37, %v3064_v37  ;;  %v2180_v12 = vsel %vm239_vm7, %v1948_v10, 0.0  ;;  %v1967_v37 = vld [vmem:[%s4012_s10] sm:$0xff] }
 0x1a6   : > { %v2161_v18 = vadd.f32 %v2160_v24, %v2159_v7  ;;  %v2497_v35 = vadd.f32 %v2496_v16, %v2495_v14  ;;  %v2518_v14 = vsel %vm239_vm7, %v2303_v1, 0.0  ;;  %v2305_v7 = vmul.f32 %v1958_v8, %v1958_v8 }
 0x1a7   : > { %v2520_v3 = vsel %vm239_vm7, %v2304_v22, 0.0  ;;  %v2306_v24 = vmul.f32 %v3067_v38, %v3067_v38 }
 0x1a8   : > { %v2499_v25 = vadd.f32 %v2498_v20, %v2497_v35  ;;  %v2163_v27 = vadd.f32 %v2162_v15, %v2161_v18  ;;  %v2184_v18 = vsel %vm239_vm7, %v1958_v8, 0.0  ;;  %v2186_v20 = vsel %vm239_vm7, %v3067_v38, 0.0 }
 0x1a9   : > { %v2522_v6 = vsel %vm239_vm7, %v2305_v7, 0.0  ;;  %v2524_v49 = vsel %vm239_vm7, %v2306_v24, 0.0 }
 0x1aa   : > { %v2165_v26 = vadd.f32 %v2164_v60, %v2163_v27  ;;  %v2501_v32 = vadd.f32 %v2500_v36, %v2499_v25 }
 0x1ac   : > { %v2503_v39 = vadd.f32 %v2502_v33, %v2501_v32  ;;  %v2167_v34 = vadd.f32 %v2166_v43, %v2165_v26 }
 0x1ae   : > { %v2169_v42 = vadd.f32 %v2168_v41, %v2167_v34  ;;  %v2505_v19 = vadd.f32 %v2504_v21, %v2503_v39  ;;  %v2196_v41 = vld [vmem:[%s4016_s11] sm:$0xff] }
 0x1b0   : > { %v2507_v45 = vadd.f32 %v2506_v17, %v2505_v19  ;;  %v2171_v11 = vadd.f32 %v2170_v47, %v2169_v42 }
 0x1b2   : > { %v2173_v4 = vadd.f32 %v2172_v48, %v2171_v11  ;;  %v2509_v52 = vadd.f32 %v2508_v44, %v2507_v45 }
 0x1b4   : > { %v2511_v0 = vadd.f32 %v2510_v55, %v2509_v52  ;;  %v2175_v30 = vadd.f32 %v2174_v50, %v2173_v4 }
 0x1b6   : > { %v2177_v61 = vadd.f32 %v2176_v23, %v2175_v30  ;;  %v2513_v62 = vadd.f32 %v2512_v56, %v2511_v0 }
 0x1b8   : > { %v2515_v5 = vadd.f32 %v2514_v58, %v2513_v62  ;;  %v2179_v59 = vadd.f32 %v2178_v29, %v2177_v61 }
 0x1ba   : > { %v2181_v53 = vadd.f32 %v2180_v12, %v2179_v59  ;;  %v2517_v28 = vadd.f32 %v2516_v2, %v2515_v5 }
 0x1bc   : > { %v2519_v16 = vadd.f32 %v2518_v14, %v2517_v28  ;;  %v2183_v13 = vadd.f32 %v2182_v9, %v2181_v53 }
 0x1be   : > { %v2185_v35 = vadd.f32 %v2184_v18, %v2183_v13  ;;  %v2521_v15 = vadd.f32 %v2520_v3, %v2519_v16 }
 0x1c0   : > { %v2187_v25 = vadd.f32 %v2186_v20, %v2185_v35  ;;  %v2523_v27 = vadd.f32 %v2522_v6, %v2521_v15 }
 0x1c2   : > { %v2188_v36 = vrot.slane %v2187_v25, 4  ;;  %v2525_v31 = vadd.f32 %v2524_v49, %v2523_v27 }
 0x1c4   : > { %v2189_v60 = vadd.f32 %v2188_v36, %v2187_v25  ;;  %v2526_v26 = vrot.slane %v2525_v31, 4 }
 0x1c6   : > { %v2190_v32 = vrot.slane %v2189_v60, 2  ;;  %v2527_v43 = vadd.f32 %v2526_v26, %v2525_v31 }
 0x1c8   : > { %v2191_v33 = vadd.f32 %v2190_v32, %v2189_v60  ;;  %v2528_v54 = vrot.slane %v2527_v43, 2 }
 0x1ca   : > { %v2192_v39 = vrot.slane %v2191_v33, 1  ;;  %v2529_v34 = vadd.f32 %v2528_v54, %v2527_v43 }
 0x1cc   : > { %v2193_v21 = vadd.f32 %v2192_v39, %v2191_v33  ;;  %v2530_v46 = vrot.slane %v2529_v34, 1 }
 0x1ce   : > { %v2531_v42 = vadd.f32 %v2530_v46, %v2529_v34  ;;  %v2194_v19 = vadd.f32 %v2193_v21, %v1967_v37 }
 0x1d0   : > { %2195 = vst.msk [vmem:[%s4012_s10] sm:$0xff] %vm239_vm7, %v2194_v19  ;;  %v2532_v47 = vadd.f32 %v2531_v42, %v2196_v41 }
 0x1d1   : > { %3144 = shalt.err (!%p3141_p6)
}
 0x1d2   : > { %s3145_s9 = scalar_lea.hbm %s4302_s27, 128  ;;  %s3149_s23 = scalar_lea.hbm %s4383_s2, 256 }
 0x1d3   : > { %p3146_p7 = scmp.ne.s32.totalorder %s4302_s27, %s3145_s9  ;;  %p3150_p11 = scmp.lt.s32.totalorder %s4302_s27, %s4383_s2 }
 0x1d4   : > { %p3151_p12 = scmp.lt.s32.totalorder %s3149_s23, %s3145_s9 }
 0x1d5   : > { %p3147_p9 = pnand %p3146_p7, %p3302_p4 }
 0x1d6   : > { %p3152_p13 = por %p3151_p12, %p3150_p11 }
 0x1d7   : > { %p3148_p10 = pneg %p3147_p9 }
 0x1d9   : > { %p3153_p0 = pnand %p3152_p13, %p3148_p10 }
 0x1db   : > { %3156 = shalt.err (!%p3153_p0)
}
 0x1dc   : > { %3070 = dma.vmem_to_hbm [thread:$0]  (%p3302_p4), %s4304_s19, 128, %s4302_s27, %s2535_s30   ;;  %2533 = vst.msk [vmem:[%s4016_s11] sm:$0xff] %vm239_vm7, %v2532_v47 }
 0x1dd   : > { %s2540_s28 = scalar_lea.sflag [#allocation5], %s3993_s8  ;;  %s3157_s4 = scalar_lea.vmem %s4313_s21, 128 }
 0x1de   : > { %p3158_p1 = scmp.ne.s32.totalorder %s4313_s21, %s3157_s4  ;;  %s3241_s5 = smov [#allocation4]  }
 0x1df   : > { %s3161_s6 = sshll.u32 %s3241_s5, 4  ;;  %s3162_s6 = int_to_ptr.vmem [resolvable:$false] %s3161_s6 }
 0x1e0   : > { %p3159_p2 = pnand %p3158_p1, %p3302_p4  ;;  %s3163_s7 = scalar_lea.vmem %s3162_s6, 256 }
 0x1e1   : > { %p3164_p5 = scmp.lt.s32.totalorder %s4313_s21, %s3162_s6  ;;  %p3165_p6 = scmp.lt.s32.totalorder %s3163_s7, %s3157_s4 }
 0x1e2   : > { %p3160_p3 = pneg %p3159_p2 }
 0x1e3   : > { %p3166_p7 = por %p3165_p6, %p3164_p5 }
 0x1e5   : > { %p3167_p9 = pnand %p3166_p7, %p3160_p3 }
 0x1e7   : > { %3170 = shalt.err (!%p3167_p9)
}
 0x1e8   : > { %s3171_s11 = scalar_lea.hbm %s4311_s29, 128  ;;  %s3175_s27 = scalar_lea.hbm %s4384_s3, 256 }
 0x1e9   : > { %p3172_p10 = scmp.ne.s32.totalorder %s4311_s29, %s3171_s11  ;;  %p3176_p13 = scmp.lt.s32.totalorder %s4311_s29, %s4384_s3 }
 0x1ea   : > { %p3177_p0 = scmp.lt.s32.totalorder %s3175_s27, %s3171_s11 }
 0x1eb   : > { %p3173_p11 = pnand %p3172_p10, %p3302_p4 }
 0x1ec   : > { %p3178_p1 = por %p3177_p0, %p3176_p13 }
 0x1ed   : > { %p3174_p12 = pneg %p3173_p11 }
 0x1ef   : > { %p3179_p2 = pnand %p3178_p1, %p3174_p12 }
 0x1f1   : > { %3182 = shalt.err (!%p3179_p2)
}
 0x1f2   : > { %3071 = dma.vmem_to_hbm [thread:$0]  (%p3302_p4), %s4313_s21, 128, %s4311_s29, %s2540_s28  }
 0x1f3 PF: > { %p3081_p3 = scmp.ge.s32.totalorder %s3237_s17, 2  ;;  %s2578_s10 = sand.u32 1, %s3217_s12  }
 0x1f4   : > { %s2579_s18 = scalar_lea.sflag [#allocation3], %s2578_s10 }
 0x1f5   : > { %p3075_p5 = pnand %p3081_p3, %p3309_p8 }
 0x1f7   : > { %p3076_p6 = pneg %p3075_p5 }
 0x1f9   : > { %3208 = dma.done.wait (%p3076_p6), %s2579_s18, 128  }
 0x1fa   : > { %3210 = vsyncadd (%p3076_p6), %s2579_s18, 4294967168  ;;  %s2588_s23 = scalar_lea.sflag [#allocation5], %s2578_s10 }
 0x1fb   : > { %3212 = dma.done.wait (%p3076_p6), %s2588_s23, 128  }
 0x1fc   : > { %3214 = vsyncadd (%p3076_p6), %s2588_s23, 4294967168  ;;  %s20_s17 = sadd.s32 1, %s3237_s17   ;;  %s4387_s12 = smov %s3221_s13 }
 0x1fd   : > { %p17_p7 = scmp.ge.s32.totalorder %s20_s17, 4   ;;  %s4388_s13 = smov %s3225_s14 }
 0x1fe   : > { %s4389_s14 = smov %s3315_s25  ;;  %s4390_s15 = smov %s3233_s16 }
 0x1ff   : > { %s4391_s16 = smov %s4393_s20  ;;  %19 = sbr.rel (!%p17_p7) target bundleno = 6 (0x6), region = 84 }
 0x204   :  { %2593 = vsyncpa [#allocation3], 1 }
 0x205   :  { %2595 = vsyncpa [#allocation3 + $0x1], 1 }
 0x206   :  { %2596 = vsyncpa [#allocation5], 1 }
 0x207   :  { %2598 = vsyncpa [#allocation5 + $0x1], 1 }

</bundles_post_ra>
